<compile_context>
chip_gen: v5e
topology: v5e:2x2
jax: 0.10.0
libtpu: 0.0.40
codegen_flags: <defaults>
</compile_context>

<pallas_src>
import functools
import math

import jax
import jax.numpy as jnp
from jax.experimental import pallas as pl
from jax.experimental.pallas import tpu as pltpu

MATMUL_DTYPE = jnp.bfloat16   # MXU operand dtype (accumulation stays f32)
ACT_DTYPE = jnp.bfloat16      # inter-kernel activation dtype
LN_EPS = 1e-5
NEG_INF = -1e9
MAX_UNSPLIT_K = 8192          # contractions up to this stay un-tiled (weight-stationary)


def _pick_vmem_limit():
    """Per-generation scoped-VMEM limit: ~75% of physical, capped at 96 MiB
    (-> ~96 MiB on v5e/v6e's 128 MiB, ~48 MiB on v7x's 64 MiB)."""
    try:
        cap = int(pltpu.get_tpu_info().vmem_capacity_bytes)
        return int(min(96 * 1024 * 1024, cap * 3 // 4))
    except Exception:
        return 32 * 1024 * 1024


VMEM_LIMIT = _pick_vmem_limit()


def _fit_tile(dim, pref, quantum):
    """Largest tile <= pref that evenly divides `dim` and is a multiple of
    `quantum`; falls back to the full dimension (always a legal block)."""
    if dim <= pref:
        return dim
    t = (pref // quantum) * quantum
    while t >= quantum:
        if dim % t == 0:
            return t
        t -= quantum
    return dim


# ------------------------- Pallas kernels -------------------------

def _linear_ws_kernel(x_ref, wt_ref, b_ref, o_ref):
    """Weight-stationary y = x @ wt + b, full-K block (no accumulator)."""
    o_ref[...] = (jnp.dot(x_ref[...].astype(MATMUL_DTYPE), wt_ref[...],
                          preferred_element_type=jnp.float32)
                  + b_ref[...]).astype(o_ref.dtype)


def _linear_ksplit_kernel(x_ref, wt_ref, b_ref, o_ref, acc_ref):
    """Fallback tiled y = x @ wt + b with a K reduction axis (K innermost)."""
    @pl.when(pl.program_id(2) == 0)
    def _init():
        acc_ref[...] = jnp.zeros_like(acc_ref)

    acc_ref[...] += jnp.dot(x_ref[...].astype(MATMUL_DTYPE), wt_ref[...],
                            preferred_element_type=jnp.float32)

    @pl.when(pl.program_id(2) == pl.num_programs(2) - 1)
    def _finalize():
        o_ref[...] = (acc_ref[...] + b_ref[...]).astype(o_ref.dtype)


def _attn_core(q, k, v, bias, o_ref, *, num_heads, dk):
    """All heads of one batch element.

    q (Sq, D) bf16, k/v (Sk, D) bf16, bias (Sq, Sk) f32 additive mask or None.
    Stores the heads ALREADY TRANSPOSED: o_ref[0] is (D, Sq) with rows
    [h*dk + i] = attn_h[:, i], so a plain row-major reshape to (Sq, D) reproduces
    PyTorch's attn.transpose(-1,-2).contiguous().view(shape)."""
    scale = 1.0 / math.sqrt(dk)
    parts = []
    for h in range(num_heads):
        lo = h * dk
        qh = q[:, lo:lo + dk]
        kh = k[:, lo:lo + dk]
        vh = v[:, lo:lo + dk]
        s = jax.lax.dot_general(qh, kh, (((1,), (1,)), ((), ())),
                                preferred_element_type=jnp.float32) * scale
        if bias is not None:
            s = s + bias                      # additive 0 / -1e9 mask bias
        s = s - jnp.max(s, axis=-1, keepdims=True)
        e = jnp.exp(s)
        # EUP reciprocal instead of a VALU divide.
        p = e * pl.reciprocal(jnp.sum(e, axis=-1, keepdims=True), approx=True)
        # (dk, Sq) = v^T @ p^T expressed directly as a dot_general (no result transpose).
        oh_t = jax.lax.dot_general(vh, p.astype(vh.dtype), (((0,), (1,)), ((), ())),
                                   preferred_element_type=jnp.float32)
        parts.append(oh_t)
    o_ref[0] = jnp.concatenate(parts, axis=0).astype(o_ref.dtype)


def _self_attn_kernel(qkv_ref, o_ref, *, num_heads, dk, d_model):
    qkv = qkv_ref[0]                                    # (S, 3D) bf16, split in VMEM
    _attn_core(qkv[:, :d_model], qkv[:, d_model:2 * d_model], qkv[:, 2 * d_model:],
               None, o_ref, num_heads=num_heads, dk=dk)


def _self_attn_masked_kernel(bias_ref, qkv_ref, o_ref, *, num_heads, dk, d_model):
    qkv = qkv_ref[0]
    _attn_core(qkv[:, :d_model], qkv[:, d_model:2 * d_model], qkv[:, 2 * d_model:],
               bias_ref[...], o_ref, num_heads=num_heads, dk=dk)


def _cross_attn_kernel(q_ref, kv_ref, o_ref, *, num_heads, dk, d_model):
    kv = kv_ref[0]                                      # (Sk, 2D) bf16, split in VMEM
    _attn_core(q_ref[0], kv[:, :d_model], kv[:, d_model:],
               None, o_ref, num_heads=num_heads, dk=dk)


def _cross_attn_masked_kernel(bias_ref, q_ref, kv_ref, o_ref, *, num_heads, dk, d_model):
    kv = kv_ref[0]
    _attn_core(q_ref[0], kv[:, :d_model], kv[:, d_model:],
               bias_ref[...], o_ref, num_heads=num_heads, dk=dk)


def _proj_add_ln_kernel(a_ref, wt_ref, b_ref, res_ref, o_ref):
    """Fused epilogue: y = a @ wt + b + residual; layer_norm over the full (S, D)
    slice of one batch element (== F.layer_norm(x, x.shape[1:]), no affine)."""
    y = jnp.dot(a_ref[0].astype(MATMUL_DTYPE), wt_ref[...],
                preferred_element_type=jnp.float32)
    y = y + b_ref[...] + res_ref[0].astype(jnp.float32)
    mean = jnp.mean(y, axis=(0, 1), keepdims=True)
    var = jnp.mean(jnp.square(y - mean), axis=(0, 1), keepdims=True)
    o_ref[0] = ((y - mean) * jax.lax.rsqrt(var + LN_EPS)).astype(o_ref.dtype)


def _ffn_add_ln_kernel(x_ref, w1t_ref, b1_ref, w2t_ref, b2_ref, o_ref, acc_ref):
    """Fused FFN + residual + layer_norm, tiled over d_ff (grid axis 1, 'arbitrary').
    acc += relu(x @ W1t[:, f] + b1[f]) @ W2t[f, :]; residual + LN at the last tile."""
    @pl.when(pl.program_id(1) == 0)
    def _init():
        acc_ref[...] = jnp.zeros_like(acc_ref)

    x = x_ref[0]
    h = jnp.dot(x.astype(MATMUL_DTYPE), w1t_ref[...],
                preferred_element_type=jnp.float32) + b1_ref[...]
    h = jnp.maximum(h, 0.0)
    acc_ref[...] += jnp.dot(h.astype(MATMUL_DTYPE), w2t_ref[...],
                            preferred_element_type=jnp.float32)

    @pl.when(pl.program_id(1) == pl.num_programs(1) - 1)
    def _finalize():
        y = acc_ref[...] + b2_ref[...] + x_ref[0].astype(jnp.float32)
        mean = jnp.mean(y, axis=(0, 1), keepdims=True)
        var = jnp.mean(jnp.square(y - mean), axis=(0, 1), keepdims=True)
        o_ref[0] = ((y - mean) * jax.lax.rsqrt(var + LN_EPS)).astype(o_ref.dtype)


# ------------------------- Pallas wrappers -------------------------

def linear(x2d, wt, b):
    """x2d (M, K), wt (K, N) bf16 (pre-transposed), b (1, N) f32 -> (M, N) bf16."""
    M, K = x2d.shape
    _, N = wt.shape
    tm = _fit_tile(M, 512, 16)          # 16-sublane quantum for bf16 output blocks
    tn = _fit_tile(N, 512, 128)
    cparams = pltpu.CompilerParams(
        dimension_semantics=("parallel", "parallel"), vmem_limit_bytes=VMEM_LIMIT)
    if K <= MAX_UNSPLIT_K:
        # Weight-stationary: M innermost, weight block index constant across it
        # (Pallas skips the re-DMA), no accumulator / K axis.
        return pl.pallas_call(
            _linear_ws_kernel,
            out_shape=jax.ShapeDtypeStruct((M, N), MATMUL_DTYPE),
            grid=(N // tn, M // tm),
            in_specs=[pl.BlockSpec((tm, K), lambda n, m: (m, 0)),
                      pl.BlockSpec((K, tn), lambda n, m: (0, n)),
                      pl.BlockSpec((1, tn), lambda n, m: (0, n))],
            out_specs=pl.BlockSpec((tm, tn), lambda n, m: (m, n)),
            compiler_params=cparams,
        )(x2d, wt, b)
    # Fallback for very large K: reduction axis innermost with an f32 accumulator.
    tk = _fit_tile(K, 2048, 128)
    return pl.pallas_call(
        _linear_ksplit_kernel,
        out_shape=jax.ShapeDtypeStruct((M, N), MATMUL_DTYPE),
        grid=(M // tm, N // tn, K // tk),
        in_specs=[pl.BlockSpec((tm, tk), lambda i, j, k: (i, k)),
                  pl.BlockSpec((tk, tn), lambda i, j, k: (k, j)),
                  pl.BlockSpec((1, tn), lambda i, j, k: (0, j))],
        out_specs=pl.BlockSpec((tm, tn), lambda i, j, k: (i, j)),
        scratch_shapes=[pltpu.VMEM((tm, tn), jnp.float32)],
        compiler_params=pltpu.CompilerParams(
            dimension_semantics=("parallel", "parallel", "arbitrary"),
            vmem_limit_bytes=VMEM_LIMIT),
    )(x2d, wt, b)


def self_attention(qkv, bias, num_heads):
    """qkv (B, S, 3D) bf16 fused projection; bias None or (S, S) f32 additive mask.
    Returns (B, D, S) bf16 (heads stored transposed -> free reshape to (B, S, D))."""
    B, S, threeD = qkv.shape
    D = threeD // 3
    dk = D // num_heads
    out_shape = jax.ShapeDtypeStruct((B, D, S), MATMUL_DTYPE)
    out_spec = pl.BlockSpec((1, D, S), lambda b: (b, 0, 0))
    qkv_spec = pl.BlockSpec((1, S, threeD), lambda b: (b, 0, 0))
    cparams = pltpu.CompilerParams(dimension_semantics=("parallel",),
                                   vmem_limit_bytes=VMEM_LIMIT)
    if bias is None:
        kern = functools.partial(_self_attn_kernel, num_heads=num_heads, dk=dk, d_model=D)
        return pl.pallas_call(kern, out_shape=out_shape, grid=(B,),
                              in_specs=[qkv_spec], out_specs=out_spec,
                              compiler_params=cparams)(qkv)
    kern = functools.partial(_self_attn_masked_kernel, num_heads=num_heads, dk=dk, d_model=D)
    return pl.pallas_call(kern, out_shape=out_shape, grid=(B,),
                          in_specs=[pl.BlockSpec((S, S), lambda b: (0, 0)), qkv_spec],
                          out_specs=out_spec, compiler_params=cparams)(bias, qkv)


def cross_attention(q, kv, bias, num_heads):
    """q (B, Sq, D) bf16, kv (B, Sk, 2D) bf16; bias None or (Sq, Sk) f32.
    Returns (B, D, Sq) bf16 (heads stored transposed)."""
    B, Sq, D = q.shape
    Sk = kv.shape[1]
    dk = D // num_heads
    out_shape = jax.ShapeDtypeStruct((B, D, Sq), MATMUL_DTYPE)
    out_spec = pl.BlockSpec((1, D, Sq), lambda b: (b, 0, 0))
    q_spec = pl.BlockSpec((1, Sq, D), lambda b: (b, 0, 0))
    kv_spec = pl.BlockSpec((1, Sk, 2 * D), lambda b: (b, 0, 0))
    cparams = pltpu.CompilerParams(dimension_semantics=("parallel",),
                                   vmem_limit_bytes=VMEM_LIMIT)
    if bias is None:
        kern = functools.partial(_cross_attn_kernel, num_heads=num_heads, dk=dk, d_model=D)
        return pl.pallas_call(kern, out_shape=out_shape, grid=(B,),
                              in_specs=[q_spec, kv_spec], out_specs=out_spec,
                              compiler_params=cparams)(q, kv)
    kern = functools.partial(_cross_attn_masked_kernel, num_heads=num_heads, dk=dk, d_model=D)
    return pl.pallas_call(kern, out_shape=out_shape, grid=(B,),
                          in_specs=[pl.BlockSpec((Sq, Sk), lambda b: (0, 0)),
                                    q_spec, kv_spec],
                          out_specs=out_spec, compiler_params=cparams)(bias, q, kv)


def proj_add_ln(a, wt, b, residual):
    """(a @ wt + b + residual) -> layer_norm over (S, D); grid over batch."""
    B, S, D = residual.shape
    return pl.pallas_call(
        _proj_add_ln_kernel,
        out_shape=jax.ShapeDtypeStruct((B, S, D), ACT_DTYPE),
        grid=(B,),
        in_specs=[pl.BlockSpec((1, S, D), lambda i: (i, 0, 0)),
                  pl.BlockSpec((D, D), lambda i: (0, 0)),
                  pl.BlockSpec((1, D), lambda i: (0, 0)),
                  pl.BlockSpec((1, S, D), lambda i: (i, 0, 0))],
        out_specs=pl.BlockSpec((1, S, D), lambda i: (i, 0, 0)),
        compiler_params=pltpu.CompilerParams(
            dimension_semantics=("parallel",), vmem_limit_bytes=VMEM_LIMIT),
    )(a, wt, b, residual)


def ffn_add_ln(x, w1t, b1, w2t, b2):
    """layer_norm( relu(x@W1t+b1)@W2t + b2 + x ) over (S, D); grid (B, d_ff tiles)."""
    B, S, D = x.shape
    Fh = w1t.shape[1]
    tf = _fit_tile(Fh, 512, 128)
    return pl.pallas_call(
        _ffn_add_ln_kernel,
        out_shape=jax.ShapeDtypeStruct((B, S, D), ACT_DTYPE),
        grid=(B, Fh // tf),
        in_specs=[pl.BlockSpec((1, S, D), lambda b, f: (b, 0, 0)),
                  pl.BlockSpec((D, tf), lambda b, f: (0, f)),
                  pl.BlockSpec((1, tf), lambda b, f: (0, f)),
                  pl.BlockSpec((tf, D), lambda b, f: (f, 0)),
                  pl.BlockSpec((1, D), lambda b, f: (0, 0))],
        out_specs=pl.BlockSpec((1, S, D), lambda b, f: (b, 0, 0)),
        scratch_shapes=[pltpu.VMEM((S, D), jnp.float32)],
        compiler_params=pltpu.CompilerParams(
            dimension_semantics=("parallel", "arbitrary"),
            vmem_limit_bytes=VMEM_LIMIT),
    )(x, w1t, b1, w2t, b2)


# ------------------------- Model glue -------------------------

def _mask_to_bias(mask, sq, sk):
    """PyTorch masked_fill(mask==0, -1e9) -> additive 0/-1e9 bias, computed once per call."""
    if mask is None:
        return None
    m = jnp.broadcast_to(mask, (sq, sk))
    return jnp.where(m == 0, jnp.float32(NEG_INF), jnp.float32(0.0))


def self_attention_block(x, p, num_heads, bias):
    B, S, D = x.shape
    qkv = linear(x.reshape(B * S, D), p["wqkv_t"], p["bqkv"]).reshape(B, S, 3 * D)
    attn_t = self_attention(qkv, bias, num_heads)           # (B, D, S), heads transposed
    # row-major reshape == PyTorch's attn.transpose(-1,-2).contiguous().view(shape);
    # no data movement (pure relabeling of the flat buffer).
    merged = attn_t.reshape(B, S, D)
    return proj_add_ln(merged, p["wo_t"], p["bo"], x)


def cross_attention_block(x, enc_out, p, num_heads, bias):
    B, Sq, D = x.shape
    Sk = enc_out.shape[1]
    q = linear(x.reshape(B * Sq, D), p["wq_t"], p["bq"]).reshape(B, Sq, D)
    kv = linear(enc_out.reshape(B * Sk, D), p["wkv_t"], p["bkv"]).reshape(B, Sk, 2 * D)
    attn_t = cross_attention(q, kv, bias, num_heads)         # (B, D, Sq)
    merged = attn_t.reshape(B, Sq, D)
    return proj_add_ln(merged, p["wo_t"], p["bo"], x)


def decoder(x, encoder_output, params, num_heads, enc_mask=None, dec_mask=None):
    B, Sd, D = x.shape
    Se = encoder_output.shape[1]
    x = x.astype(ACT_DTYPE)
    enc = encoder_output.astype(ACT_DTYPE)
    dec_bias = _mask_to_bias(dec_mask, Sd, Sd)
    enc_bias = _mask_to_bias(enc_mask, Sd, Se)
    for lp in params:
        x = self_attention_block(x, lp["self_attn"], num_heads, dec_bias)
        x = cross_attention_block(x, enc, lp["cross_attn"], num_heads, enc_bias)
        x = ffn_add_ln(x, lp["w1_t"], lp["b1"], lp["w2_t"], lp["b2"])
    return x.astype(jnp.float32)


# ------------------------- Parameter init & one-time prep -------------------------

def _init_linear(key, out_f, in_f):
    k1, k2 = jax.random.split(key)
    bound = 1.0 / math.sqrt(in_f)
    w = jax.random.uniform(k1, (out_f, in_f), jnp.float32, -bound, bound)
    b = jax.random.uniform(k2, (out_f,), jnp.float32, -bound, bound)
    # Pre-round weights onto the bf16 grid so the kernel-side bf16 cast is lossless
    # and the f32 reference uses numerically identical weights.
    w = w.astype(jnp.bfloat16).astype(jnp.float32)
    return w, b


def _init_mha(key, d_model):
    ks = jax.random.split(key, 4)
    p = {}
    for name, kk in zip(("q", "k", "v", "o"), ks):
        w, b = _init_linear(kk, d_model, d_model)
        p["w" + name] = w
        p["b" + name] = b
    return p


def init_decoder_params(key, d_model, d_ff, num_layers):
    params = []
    for _ in range(num_layers):
        key, k1, k2, k3, k4 = jax.random.split(key, 5)
        w1, b1 = _init_linear(k3, d_ff, d_model)
        w2, b2 = _init_linear(k4, d_model, d_ff)
        params.append({"self_attn": _init_mha(k1, d_model),
                       "cross_attn": _init_mha(k2, d_model),
                       "w1": w1, "b1": b1, "w2": w2, "b2": b2})
    return params


def prepare_params(raw_params):
    """One-time prep: transpose to (in, out), fuse QKV / KV, cast weights to bf16."""
    prepped = []
    for lp in raw_params:
        sa, ca = lp["self_attn"], lp["cross_attn"]
        prepped.append({
            "self_attn": {
                "wqkv_t": jnp.concatenate([sa["wq"], sa["wk"], sa["wv"]],
                                          axis=0).T.astype(MATMUL_DTYPE),
                "bqkv": jnp.concatenate([sa["bq"], sa["bk"], sa["bv"]])[None, :],
                "wo_t": sa["wo"].T.astype(MATMUL_DTYPE),
                "bo": sa["bo"][None, :],
            },
            "cross_attn": {
                "wq_t": ca["wq"].T.astype(MATMUL_DTYPE),
                "bq": ca["bq"][None, :],
                "wkv_t": jnp.concatenate([ca["wk"], ca["wv"]],
                                         axis=0).T.astype(MATMUL_DTYPE),
                "bkv": jnp.concatenate([ca["bk"], ca["bv"]])[None, :],
                "wo_t": ca["wo"].T.astype(MATMUL_DTYPE),
                "bo": ca["bo"][None, :],
            },
            "w1_t": lp["w1"].T.astype(MATMUL_DTYPE), "b1": lp["b1"][None, :],
            "w2_t": lp["w2"].T.astype(MATMUL_DTYPE), "b2": lp["b2"][None, :],
        })
    return prepped


# ------------------------- Pure-JAX f32 reference (sanity check) -------------------------

def _ref_mha(q_in, k_in, v_in, p, h, mask=None):
    B, Sq, D = q_in.shape
    Sk = k_in.shape[1]
    dk = D // h
    lin = lambda x, w, b: x @ w.T + b
    q = lin(q_in, p["wq"], p["bq"]).reshape(B, Sq, h, dk).transpose(0, 2, 1, 3)
    k = lin(k_in, p["wk"], p["bk"]).reshape(B, Sk, h, dk).transpose(0, 2, 1, 3)
    v = lin(v_in, p["wv"], p["bv"]).reshape(B, Sk, h, dk).transpose(0, 2, 1, 3)
    s = q @ jnp.swapaxes(k, -1, -2) / math.sqrt(dk)
    if mask is not None:
        s = jnp.where(mask == 0, -1e9, s)
    a = jax.nn.softmax(s, axis=-1) @ v
    a = jnp.swapaxes(a, -1, -2).reshape(B, Sq, D)   # faithful transpose(-1,-2).view
    return lin(a, p["wo"], p["bo"])


def _ref_ln(y):
    mean = jnp.mean(y, axis=(1, 2), keepdims=True)
    var = jnp.mean((y - mean) ** 2, axis=(1, 2), keepdims=True)
    return (y - mean) * jax.lax.rsqrt(var + LN_EPS)


def _ref_decoder(x, enc, params, h, enc_mask=None, dec_mask=None):
    for lp in params:
        r = x
        x = _ref_mha(x, x, x, lp["self_attn"], h, dec_mask)
        x = _ref_ln(x + r)
        r = x
        x = _ref_mha(x, enc, enc, lp["cross_attn"], h, enc_mask)
        x = _ref_ln(x + r)
        r = x
        hid = jnp.maximum(x @ lp["w1"].T + lp["b1"], 0.0)
        x = _ref_ln(hid @ lp["w2"].T + lp["b2"] + r)
    return x


# ------------------------- Main -------------------------

if __name__ == "__main__":
    B, S_DEC, S_ENC, D_MODEL, NUM_HEADS, D_FF, NUM_LAYERS = 2, 8, 8, 32, 4, 64, 2

    key = jax.random.PRNGKey(0)
    kx, ke, kp = jax.random.split(key, 3)
    # Pre-round inputs onto the bf16 grid so the kernel-side activation casts are
    # lossless relative to the f32 reference (weights are handled the same way).
    x = jax.random.normal(kx, (B, S_DEC, D_MODEL), jnp.float32)
    x = x.astype(jnp.bfloat16).astype(jnp.float32)
    enc_out = jax.random.normal(ke, (B, S_ENC, D_MODEL), jnp.float32)
    enc_out = enc_out.astype(jnp.bfloat16).astype(jnp.float32)
    raw_params = init_decoder_params(kp, D_MODEL, D_FF, NUM_LAYERS)
    params = prepare_params(raw_params)

    run = jax.jit(decoder, static_argnames=("num_heads",))

    # --- unmasked path (module defaults: encoder_mask = decoder_mask = None)
    out = jax.block_until_ready(run(x, enc_out, params, num_heads=NUM_HEADS))
    ref = _ref_decoder(x, enc_out, raw_params, NUM_HEADS)
    assert out.shape == (B, S_DEC, D_MODEL)
    # bf16 MXU operands / bf16 trunk activations (f32 accumulation & LN) vs an
    # all-f32 reference -> loose tolerance.
    assert jnp.allclose(out, ref, atol=5e-2, rtol=5e-2), \
        float(jnp.max(jnp.abs(out - ref)))

    # --- masked path (causal decoder mask), exercises the masked attention kernels
    causal = jnp.tril(jnp.ones((S_DEC, S_DEC), jnp.float32))
    out_m = jax.block_until_ready(
        run(x, enc_out, params, num_heads=NUM_HEADS, dec_mask=causal))
    ref_m = _ref_decoder(x, enc_out, raw_params, NUM_HEADS, dec_mask=causal)
    assert jnp.allclose(out_m, ref_m, atol=5e-2, rtol=5e-2), \
        float(jnp.max(jnp.abs(out_m - ref_m)))

    print("KERNEL_OK")
</pallas_src>

<mosaic_0001>
module attributes {stable_mosaic.version = 11 : i64} {
  func.func @_linear_ws_kernel(%arg0: i32, %arg1: i32, %arg2: memref<16x32xbf16, #tpu.memory_space<vmem>>, %arg3: memref<32x64xbf16, #tpu.memory_space<vmem>>, %arg4: memref<1x64xf32, #tpu.memory_space<vmem>>, %arg5: memref<16x64xbf16, #tpu.memory_space<vmem>>) attributes {dimension_semantics = [#tpu.dimension_semantics<parallel>, #tpu.dimension_semantics<parallel>], iteration_bounds = array<i64: 1, 1>, scalar_prefetch = 0 : i64, scratch_operands = 0 : i64, tpu.core_type = #tpu.core_type<tc>, window_params = [{transform_indices = @transform_0, window_bounds = array<i64: 16, 32>}, {transform_indices = @transform_1, window_bounds = array<i64: 32, 64>}, {transform_indices = @transform_2, window_bounds = array<i64: 1, 64>}, {transform_indices = @transform_3, window_bounds = array<i64: 16, 64>}]} {
    %c0 = arith.constant 0 : index
    %c0_0 = arith.constant 0 : index
    %0 = vector.load %arg2[%c0, %c0_0] : memref<16x32xbf16, #tpu.memory_space<vmem>>, vector<16x32xbf16>
    %c0_1 = arith.constant 0 : index
    %c0_2 = arith.constant 0 : index
    %1 = vector.load %arg3[%c0_1, %c0_2] : memref<32x64xbf16, #tpu.memory_space<vmem>>, vector<32x64xbf16>
    %cst = arith.constant dense<0.000000e+00> : vector<16x64xf32>
    %2 = tpu.matmul %0, %1, %cst {dimension_numbers = #tpu.dot_dimension_numbers<[1], [0], [0], [1], [0, 0, 1, 1], [], []>} : vector<16x32xbf16>, vector<32x64xbf16>, vector<16x64xf32> -> vector<16x64xf32>
    %c0_3 = arith.constant 0 : index
    %c0_4 = arith.constant 0 : index
    %3 = vector.load %arg4[%c0_3, %c0_4] : memref<1x64xf32, #tpu.memory_space<vmem>>, vector<1x64xf32>
    %4 = vector.broadcast %3 : vector<1x64xf32> to vector<16x64xf32>
    %5 = arith.addf %2, %4 : vector<16x64xf32>
    %6 = arith.truncf %5 : vector<16x64xf32> to vector<16x64xbf16>
    %c0_5 = arith.constant 0 : index
    %c0_6 = arith.constant 0 : index
    %7 = vector.load %arg5[%c0_5, %c0_6] : memref<16x64xbf16, #tpu.memory_space<vmem>>, vector<16x64xbf16>
    tpu.vector_store %arg5[%c0_5, %c0_6], %6 {strides = array<i32>} : memref<16x64xbf16, #tpu.memory_space<vmem>>, vector<16x64xbf16>,
    return
  }
  func.func @transform_0(%arg0: i32, %arg1: i32) -> (i32, i32) {
    %c0_i32 = arith.constant 0 : i32
    %c0_i32_0 = arith.constant 0 : i32
    return %arg1, %c0_i32 : i32, i32
  }
  func.func @transform_1(%arg0: i32, %arg1: i32) -> (i32, i32) {
    %c0_i32 = arith.constant 0 : i32
    %c0_i32_0 = arith.constant 0 : i32
    return %c0_i32, %arg0 : i32, i32
  }
  func.func @transform_2(%arg0: i32, %arg1: i32) -> (i32, i32) {
    %c0_i32 = arith.constant 0 : i32
    %c0_i32_0 = arith.constant 0 : i32
    return %c0_i32, %arg0 : i32, i32
  }
  func.func @transform_3(%arg0: i32, %arg1: i32) -> (i32, i32) {
    %c0_i32 = arith.constant 0 : i32
    return %arg1, %arg0 : i32, i32
  }
}

module attributes {stable_mosaic.version = 11 : i64} {
  func.func @_linear_ws_kernel(%arg0: i32, %arg1: i32, %arg2: memref<16x32xbf16, #tpu.memory_space<vmem>>, %arg3: memref<32x64xbf16, #tpu.memory_space<vmem>>, %arg4: memref<1x64xf32, #tpu.memory_space<vmem>>, %arg5: memref<16x64xbf16, #tpu.memory_space<vmem>>) attributes {dimension_semantics = [#tpu.dimension_semantics<parallel>, #tpu.dimension_semantics<parallel>], iteration_bounds = array<i64: 1, 1>, scalar_prefetch = 0 : i64, scratch_operands = 0 : i64, tpu.core_type = #tpu.core_type<tc>, window_params = [{transform_indices = @transform_0, window_bounds = array<i64: 16, 32>}, {transform_indices = @transform_1, window_bounds = array<i64: 32, 64>}, {transform_indices = @transform_2, window_bounds = array<i64: 1, 64>}, {transform_indices = @transform_3, window_bounds = array<i64: 16, 64>}]} {
    %c0 = arith.constant 0 : index
    %c0_0 = arith.constant 0 : index
    %0 = vector.load %arg2[%c0, %c0_0] : memref<16x32xbf16, #tpu.memory_space<vmem>>, vector<16x32xbf16>
    %c0_1 = arith.constant 0 : index
    %c0_2 = arith.constant 0 : index
    %1 = vector.load %arg3[%c0_1, %c0_2] : memref<32x64xbf16, #tpu.memory_space<vmem>>, vector<32x64xbf16>
    %cst = arith.constant dense<0.000000e+00> : vector<16x64xf32>
    %2 = tpu.matmul %0, %1, %cst {dimension_numbers = #tpu.dot_dimension_numbers<[1], [0], [0], [1], [0, 0, 1, 1], [], []>} : vector<16x32xbf16>, vector<32x64xbf16>, vector<16x64xf32> -> vector<16x64xf32>
    %c0_3 = arith.constant 0 : index
    %c0_4 = arith.constant 0 : index
    %3 = vector.load %arg4[%c0_3, %c0_4] : memref<1x64xf32, #tpu.memory_space<vmem>>, vector<1x64xf32>
    %4 = vector.broadcast %3 : vector<1x64xf32> to vector<16x64xf32>
    %5 = arith.addf %2, %4 : vector<16x64xf32>
    %6 = arith.truncf %5 : vector<16x64xf32> to vector<16x64xbf16>
    %c0_5 = arith.constant 0 : index
    %c0_6 = arith.constant 0 : index
    %7 = vector.load %arg5[%c0_5, %c0_6] : memref<16x64xbf16, #tpu.memory_space<vmem>>, vector<16x64xbf16>
    tpu.vector_store %arg5[%c0_5, %c0_6], %6 {strides = array<i32>} : memref<16x64xbf16, #tpu.memory_space<vmem>>, vector<16x64xbf16>,
    return
  }
  func.func @transform_0(%arg0: i32, %arg1: i32) -> (i32, i32) {
    %c0_i32 = arith.constant 0 : i32
    %c0_i32_0 = arith.constant 0 : i32
    return %arg1, %c0_i32 : i32, i32
  }
  func.func @transform_1(%arg0: i32, %arg1: i32) -> (i32, i32) {
    %c0_i32 = arith.constant 0 : i32
    %c0_i32_0 = arith.constant 0 : i32
    return %c0_i32, %arg0 : i32, i32
  }
  func.func @transform_2(%arg0: i32, %arg1: i32) -> (i32, i32) {
    %c0_i32 = arith.constant 0 : i32
    %c0_i32_0 = arith.constant 0 : i32
    return %c0_i32, %arg0 : i32, i32
  }
  func.func @transform_3(%arg0: i32, %arg1: i32) -> (i32, i32) {
    %c0_i32 = arith.constant 0 : i32
    return %arg1, %arg0 : i32, i32
  }
}

module attributes {stable_mosaic.version = 11 : i64} {
  func.func @_linear_ws_kernel(%arg0: i32, %arg1: i32, %arg2: memref<16x32xbf16, #tpu.memory_space<vmem>>, %arg3: memref<32x96xbf16, #tpu.memory_space<vmem>>, %arg4: memref<1x96xf32, #tpu.memory_space<vmem>>, %arg5: memref<16x96xbf16, #tpu.memory_space<vmem>>) attributes {dimension_semantics = [#tpu.dimension_semantics<parallel>, #tpu.dimension_semantics<parallel>], iteration_bounds = array<i64: 1, 1>, scalar_prefetch = 0 : i64, scratch_operands = 0 : i64, tpu.core_type = #tpu.core_type<tc>, window_params = [{transform_indices = @transform_0, window_bounds = array<i64: 16, 32>}, {transform_indices = @transform_1, window_bounds = array<i64: 32, 96>}, {transform_indices = @transform_2, window_bounds = array<i64: 1, 96>}, {transform_indices = @transform_3, window_bounds = array<i64: 16, 96>}]} {
    %c0 = arith.constant 0 : index
    %c0_0 = arith.constant 0 : index
    %0 = vector.load %arg2[%c0, %c0_0] : memref<16x32xbf16, #tpu.memory_space<vmem>>, vector<16x32xbf16>
    %c0_1 = arith.constant 0 : index
    %c0_2 = arith.constant 0 : index
    %1 = vector.load %arg3[%c0_1, %c0_2] : memref<32x96xbf16, #tpu.memory_space<vmem>>, vector<32x96xbf16>
    %cst = arith.constant dense<0.000000e+00> : vector<16x96xf32>
    %2 = tpu.matmul %0, %1, %cst {dimension_numbers = #tpu.dot_dimension_numbers<[1], [0], [0], [1], [0, 0, 1, 1], [], []>} : vector<16x32xbf16>, vector<32x96xbf16>, vector<16x96xf32> -> vector<16x96xf32>
    %c0_3 = arith.constant 0 : index
    %c0_4 = arith.constant 0 : index
    %3 = vector.load %arg4[%c0_3, %c0_4] : memref<1x96xf32, #tpu.memory_space<vmem>>, vector<1x96xf32>
    %4 = vector.broadcast %3 : vector<1x96xf32> to vector<16x96xf32>
    %5 = arith.addf %2, %4 : vector<16x96xf32>
    %6 = arith.truncf %5 : vector<16x96xf32> to vector<16x96xbf16>
    %c0_5 = arith.constant 0 : index
    %c0_6 = arith.constant 0 : index
    %7 = vector.load %arg5[%c0_5, %c0_6] : memref<16x96xbf16, #tpu.memory_space<vmem>>, vector<16x96xbf16>
    tpu.vector_store %arg5[%c0_5, %c0_6], %6 {strides = array<i32>} : memref<16x96xbf16, #tpu.memory_space<vmem>>, vector<16x96xbf16>,
    return
  }
  func.func @transform_0(%arg0: i32, %arg1: i32) -> (i32, i32) {
    %c0_i32 = arith.constant 0 : i32
    %c0_i32_0 = arith.constant 0 : i32
    return %arg1, %c0_i32 : i32, i32
  }
  func.func @transform_1(%arg0: i32, %arg1: i32) -> (i32, i32) {
    %c0_i32 = arith.constant 0 : i32
    %c0_i32_0 = arith.constant 0 : i32
    return %c0_i32, %arg0 : i32, i32
  }
  func.func @transform_2(%arg0: i32, %arg1: i32) -> (i32, i32) {
    %c0_i32 = arith.constant 0 : i32
    %c0_i32_0 = arith.constant 0 : i32
    return %c0_i32, %arg0 : i32, i32
  }
  func.func @transform_3(%arg0: i32, %arg1: i32) -> (i32, i32) {
    %c0_i32 = arith.constant 0 : i32
    return %arg1, %arg0 : i32, i32
  }
}

module attributes {stable_mosaic.version = 11 : i64} {
  func.func @_self_attn_kernel(%arg0: i32, %arg1: memref<1x8x96xbf16, #tpu.memory_space<vmem>>, %arg2: memref<1x32x8xbf16, #tpu.memory_space<vmem>>) attributes {dimension_semantics = [#tpu.dimension_semantics<parallel>], iteration_bounds = array<i64: 2>, scalar_prefetch = 0 : i64, scratch_operands = 0 : i64, tpu.core_type = #tpu.core_type<tc>, window_params = [{transform_indices = @transform_0, window_bounds = array<i64: 1, 8, 96>}, {transform_indices = @transform_1, window_bounds = array<i64: 1, 32, 8>}]} {
    %c0 = arith.constant 0 : index
    %c0_0 = arith.constant 0 : index
    %c0_1 = arith.constant 0 : index
    %0 = vector.load %arg1[%c0, %c0_0, %c0_1] : memref<1x8x96xbf16, #tpu.memory_space<vmem>>, vector<1x8x96xbf16>
    %1 = vector.shape_cast %0 : vector<1x8x96xbf16> to vector<8x96xbf16>
    %2 = vector.extract_strided_slice %1 {offsets = [0, 0], sizes = [8, 32], strides = [1, 1]} : vector<8x96xbf16> to vector<8x32xbf16>
    %3 = vector.extract_strided_slice %1 {offsets = [0, 32], sizes = [8, 32], strides = [1, 1]} : vector<8x96xbf16> to vector<8x32xbf16>
    %4 = vector.extract_strided_slice %1 {offsets = [0, 64], sizes = [8, 32], strides = [1, 1]} : vector<8x96xbf16> to vector<8x32xbf16>
    %5 = vector.extract_strided_slice %2 {offsets = [0, 0], sizes = [8, 8], strides = [1, 1]} : vector<8x32xbf16> to vector<8x8xbf16>
    %6 = vector.extract_strided_slice %3 {offsets = [0, 0], sizes = [8, 8], strides = [1, 1]} : vector<8x32xbf16> to vector<8x8xbf16>
    %7 = vector.extract_strided_slice %4 {offsets = [0, 0], sizes = [8, 8], strides = [1, 1]} : vector<8x32xbf16> to vector<8x8xbf16>
    %cst = arith.constant dense<0.000000e+00> : vector<8x8xf32>
    %8 = tpu.matmul %5, %6, %cst {dimension_numbers = #tpu.dot_dimension_numbers<[1], [1], [0], [0], [0, 0, 1, 0], [], []>} : vector<8x8xbf16>, vector<8x8xbf16>, vector<8x8xf32> -> vector<8x8xf32>
    %cst_2 = arith.constant 0.353553385 : f32
    %9 = vector.broadcast %cst_2 : f32 to vector<8x8xf32>
    %10 = arith.mulf %8, %9 : vector<8x8xf32>
    %cst_3 = arith.constant dense<0xFF800000> : vector<8xf32>
    %11 = vector.multi_reduction <maximumf>, %10, %cst_3 [1] : vector<8x8xf32> to vector<8xf32>
    %12 = vector.shape_cast %11 : vector<8xf32> to vector<8x1xf32>
    %13 = vector.broadcast %12 : vector<8x1xf32> to vector<8x8xf32>
    %14 = arith.subf %10, %13 : vector<8x8xf32>
    %15 = math.exp %14 : vector<8x8xf32>
    %cst_4 = arith.constant dense<0.000000e+00> : vector<8xf32>
    %16 = vector.multi_reduction <add>, %15, %cst_4 [1] : vector<8x8xf32> to vector<8xf32>
    %17 = vector.shape_cast %16 : vector<8xf32> to vector<8x1xf32>
    %18 = tpu.reciprocal %17 {approx = true} : vector<8x1xf32> -> vector<8x1xf32>
    %19 = vector.broadcast %18 : vector<8x1xf32> to vector<8x8xf32>
    %20 = arith.mulf %15, %19 : vector<8x8xf32>
    %21 = arith.truncf %20 : vector<8x8xf32> to vector<8x8xbf16>
    %cst_5 = arith.constant dense<0.000000e+00> : vector<8x8xf32>
    %22 = tpu.matmul %7, %21, %cst_5 {dimension_numbers = #tpu.dot_dimension_numbers<[0], [1], [1], [0], [0, 1, 1, 0], [], []>} : vector<8x8xbf16>, vector<8x8xbf16>, vector<8x8xf32> -> vector<8x8xf32>
    %23 = vector.extract_strided_slice %2 {offsets = [0, 8], sizes = [8, 8], strides = [1, 1]} : vector<8x32xbf16> to vector<8x8xbf16>
    %24 = vector.extract_strided_slice %3 {offsets = [0, 8], sizes = [8, 8], strides = [1, 1]} : vector<8x32xbf16> to vector<8x8xbf16>
    %25 = vector.extract_strided_slice %4 {offsets = [0, 8], sizes = [8, 8], strides = [1, 1]} : vector<8x32xbf16> to vector<8x8xbf16>
    %cst_6 = arith.constant dense<0.000000e+00> : vector<8x8xf32>
    %26 = tpu.matmul %23, %24, %cst_6 {dimension_numbers = #tpu.dot_dimension_numbers<[1], [1], [0], [0], [0, 0, 1, 0], [], []>} : vector<8x8xbf16>, vector<8x8xbf16>, vector<8x8xf32> -> vector<8x8xf32>
    %cst_7 = arith.constant 0.353553385 : f32
    %27 = vector.broadcast %cst_7 : f32 to vector<8x8xf32>
    %28 = arith.mulf %26, %27 : vector<8x8xf32>
    %cst_8 = arith.constant dense<0xFF800000> : vector<8xf32>
    %29 = vector.multi_reduction <maximumf>, %28, %cst_8 [1] : vector<8x8xf32> to vector<8xf32>
    %30 = vector.shape_cast %29 : vector<8xf32> to vector<8x1xf32>
    %31 = vector.broadcast %30 : vector<8x1xf32> to vector<8x8xf32>
    %32 = arith.subf %28, %31 : vector<8x8xf32>
    %33 = math.exp %32 : vector<8x8xf32>
    %cst_9 = arith.constant dense<0.000000e+00> : vector<8xf32>
    %34 = vector.multi_reduction <add>, %33, %cst_9 [1] : vector<8x8xf32> to vector<8xf32>
    %35 = vector.shape_cast %34 : vector<8xf32> to vector<8x1xf32>
    %36 = tpu.reciprocal %35 {approx = true} : vector<8x1xf32> -> vector<8x1xf32>
    %37 = vector.broadcast %36 : vector<8x1xf32> to vector<8x8xf32>
    %38 = arith.mulf %33, %37 : vector<8x8xf32>
    %39 = arith.truncf %38 : vector<8x8xf32> to vector<8x8xbf16>
    %cst_10 = arith.constant dense<0.000000e+00> : vector<8x8xf32>
    %40 = tpu.matmul %25, %39, %cst_10 {dimension_numbers = #tpu.dot_dimension_numbers<[0], [1], [1], [0], [0, 1, 1, 0], [], []>} : vector<8x8xbf16>, vector<8x8xbf16>, vector<8x8xf32> -> vector<8x8xf32>
    %41 = vector.extract_strided_slice %2 {offsets = [0, 16], sizes = [8, 8], strides = [1, 1]} : vector<8x32xbf16> to vector<8x8xbf16>
    %42 = vector.extract_strided_slice %3 {offsets = [0, 16], sizes = [8, 8], strides = [1, 1]} : vector<8x32xbf16> to vector<8x8xbf16>
    %43 = vector.extract_strided_slice %4 {offsets = [0, 16], sizes = [8, 8], strides = [1, 1]} : vector<8x32xbf16> to vector<8x8xbf16>
    %cst_11 = arith.constant dense<0.000000e+00> : vector<8x8xf32>
    %44 = tpu.matmul %41, %42, %cst_11 {dimension_numbers = #tpu.dot_dimension_numbers<[1], [1], [0], [0], [0, 0, 1, 0], [], []>} : vector<8x8xbf16>, vector<8x8xbf16>, vector<8x8xf32> -> vector<8x8xf32>
    %cst_12 = arith.constant 0.353553385 : f32
    %45 = vector.broadcast %cst_12 : f32 to vector<8x8xf32>
    %46 = arith.mulf %44, %45 : vector<8x8xf32>
    %cst_13 = arith.constant dense<0xFF800000> : vector<8xf32>
    %47 = vector.multi_reduction <maximumf>, %46, %cst_13 [1] : vector<8x8xf32> to vector<8xf32>
    %48 = vector.shape_cast %47 : vector<8xf32> to vector<8x1xf32>
    %49 = vector.broadcast %48 : vector<8x1xf32> to vector<8x8xf32>
    %50 = arith.subf %46, %49 : vector<8x8xf32>
    %51 = math.exp %50 : vector<8x8xf32>
    %cst_14 = arith.constant dense<0.000000e+00> : vector<8xf32>
    %52 = vector.multi_reduction <add>, %51, %cst_14 [1] : vector<8x8xf32> to vector<8xf32>
    %53 = vector.shape_cast %52 : vector<8xf32> to vector<8x1xf32>
    %54 = tpu.reciprocal %53 {approx = true} : vector<8x1xf32> -> vector<8x1xf32>
    %55 = vector.broadcast %54 : vector<8x1xf32> to vector<8x8xf32>
    %56 = arith.mulf %51, %55 : vector<8x8xf32>
    %57 = arith.truncf %56 : vector<8x8xf32> to vector<8x8xbf16>
    %cst_15 = arith.constant dense<0.000000e+00> : vector<8x8xf32>
    %58 = tpu.matmul %43, %57, %cst_15 {dimension_numbers = #tpu.dot_dimension_numbers<[0], [1], [1], [0], [0, 1, 1, 0], [], []>} : vector<8x8xbf16>, vector<8x8xbf16>, vector<8x8xf32> -> vector<8x8xf32>
    %59 = vector.extract_strided_slice %2 {offsets = [0, 24], sizes = [8, 8], strides = [1, 1]} : vector<8x32xbf16> to vector<8x8xbf16>
    %60 = vector.extract_strided_slice %3 {offsets = [0, 24], sizes = [8, 8], strides = [1, 1]} : vector<8x32xbf16> to vector<8x8xbf16>
    %61 = vector.extract_strided_slice %4 {offsets = [0, 24], sizes = [8, 8], strides = [1, 1]} : vector<8x32xbf16> to vector<8x8xbf16>
    %cst_16 = arith.constant dense<0.000000e+00> : vector<8x8xf32>
    %62 = tpu.matmul %59, %60, %cst_16 {dimension_numbers = #tpu.dot_dimension_numbers<[1], [1], [0], [0], [0, 0, 1, 0], [], []>} : vector<8x8xbf16>, vector<8x8xbf16>, vector<8x8xf32> -> vector<8x8xf32>
    %cst_17 = arith.constant 0.353553385 : f32
    %63 = vector.broadcast %cst_17 : f32 to vector<8x8xf32>
    %64 = arith.mulf %62, %63 : vector<8x8xf32>
    %cst_18 = arith.constant dense<0xFF800000> : vector<8xf32>
    %65 = vector.multi_reduction <maximumf>, %64, %cst_18 [1] : vector<8x8xf32> to vector<8xf32>
    %66 = vector.shape_cast %65 : vector<8xf32> to vector<8x1xf32>
    %67 = vector.broadcast %66 : vector<8x1xf32> to vector<8x8xf32>
    %68 = arith.subf %64, %67 : vector<8x8xf32>
    %69 = math.exp %68 : vector<8x8xf32>
    %cst_19 = arith.constant dense<0.000000e+00> : vector<8xf32>
    %70 = vector.multi_reduction <add>, %69, %cst_19 [1] : vector<8x8xf32> to vector<8xf32>
    %71 = vector.shape_cast %70 : vector<8xf32> to vector<8x1xf32>
    %72 = tpu.reciprocal %71 {approx = true} : vector<8x1xf32> -> vector<8x1xf32>
    %73 = vector.broadcast %72 : vector<8x1xf32> to vector<8x8xf32>
    %74 = arith.mulf %69, %73 : vector<8x8xf32>
    %75 = arith.truncf %74 : vector<8x8xf32> to vector<8x8xbf16>
    %cst_20 = arith.constant dense<0.000000e+00> : vector<8x8xf32>
    %76 = tpu.matmul %61, %75, %cst_20 {dimension_numbers = #tpu.dot_dimension_numbers<[0], [1], [1], [0], [0, 1, 1, 0], [], []>} : vector<8x8xbf16>, vector<8x8xbf16>, vector<8x8xf32> -> vector<8x8xf32>
    %77 = tpu.concatenate %22, %40, %58, %76 in 0 : vector<8x8xf32>, vector<8x8xf32>, vector<8x8xf32>, vector<8x8xf32> -> vector<32x8xf32>
    %78 = arith.truncf %77 : vector<32x8xf32> to vector<32x8xbf16>
    %c0_21 = arith.constant 0 : index
    %c0_22 = arith.constant 0 : index
    %c0_23 = arith.constant 0 : index
    %79 = vector.load %arg2[%c0_21, %c0_22, %c0_23] : memref<1x32x8xbf16, #tpu.memory_space<vmem>>, vector<1x32x8xbf16>
    %80 = vector.shape_cast %79 : vector<1x32x8xbf16> to vector<32x8xbf16>
    %81 = vector.shape_cast %78 : vector<32x8xbf16> to vector<1x32x8xbf16>
    tpu.vector_store %arg2[%c0_21, %c0_22, %c0_23], %81 {strides = array<i32>} : memref<1x32x8xbf16, #tpu.memory_space<vmem>>, vector<1x32x8xbf16>,
    return
  }
  func.func @transform_0(%arg0: i32) -> (i32, i32, i32) {
    %c0_i32 = arith.constant 0 : i32
    %c0_i32_0 = arith.constant 0 : i32
    %c0_i32_1 = arith.constant 0 : i32
    return %arg0, %c0_i32, %c0_i32_0 : i32, i32, i32
  }
  func.func @transform_1(%arg0: i32) -> (i32, i32, i32) {
    %c0_i32 = arith.constant 0 : i32
    %c0_i32_0 = arith.constant 0 : i32
    %c0_i32_1 = arith.constant 0 : i32
    return %arg0, %c0_i32, %c0_i32_0 : i32, i32, i32
  }
}

module attributes {stable_mosaic.version = 11 : i64} {
  func.func @_linear_ws_kernel(%arg0: i32, %arg1: i32, %arg2: memref<16x32xbf16, #tpu.memory_space<vmem>>, %arg3: memref<32x32xbf16, #tpu.memory_space<vmem>>, %arg4: memref<1x32xf32, #tpu.memory_space<vmem>>, %arg5: memref<16x32xbf16, #tpu.memory_space<vmem>>) attributes {dimension_semantics = [#tpu.dimension_semantics<parallel>, #tpu.dimension_semantics<parallel>], iteration_bounds = array<i64: 1, 1>, scalar_prefetch = 0 : i64, scratch_operands = 0 : i64, tpu.core_type = #tpu.core_type<tc>, window_params = [{transform_indices = @transform_0, window_bounds = array<i64: 16, 32>}, {transform_indices = @transform_1, window_bounds = array<i64: 32, 32>}, {transform_indices = @transform_2, window_bounds = array<i64: 1, 32>}, {transform_indices = @transform_3, window_bounds = array<i64: 16, 32>}]} {
    %c0 = arith.constant 0 : index
    %c0_0 = arith.constant 0 : index
    %0 = vector.load %arg2[%c0, %c0_0] : memref<16x32xbf16, #tpu.memory_space<vmem>>, vector<16x32xbf16>
    %c0_1 = arith.constant 0 : index
    %c0_2 = arith.constant 0 : index
    %1 = vector.load %arg3[%c0_1, %c0_2] : memref<32x32xbf16, #tpu.memory_space<vmem>>, vector<32x32xbf16>
    %cst = arith.constant dense<0.000000e+00> : vector<16x32xf32>
    %2 = tpu.matmul %0, %1, %cst {dimension_numbers = #tpu.dot_dimension_numbers<[1], [0], [0], [1], [0, 0, 1, 1], [], []>} : vector<16x32xbf16>, vector<32x32xbf16>, vector<16x32xf32> -> vector<16x32xf32>
    %c0_3 = arith.constant 0 : index
    %c0_4 = arith.constant 0 : index
    %3 = vector.load %arg4[%c0_3, %c0_4] : memref<1x32xf32, #tpu.memory_space<vmem>>, vector<1x32xf32>
    %4 = vector.broadcast %3 : vector<1x32xf32> to vector<16x32xf32>
    %5 = arith.addf %2, %4 : vector<16x32xf32>
    %6 = arith.truncf %5 : vector<16x32xf32> to vector<16x32xbf16>
    %c0_5 = arith.constant 0 : index
    %c0_6 = arith.constant 0 : index
    %7 = vector.load %arg5[%c0_5, %c0_6] : memref<16x32xbf16, #tpu.memory_space<vmem>>, vector<16x32xbf16>
    tpu.vector_store %arg5[%c0_5, %c0_6], %6 {strides = array<i32>} : memref<16x32xbf16, #tpu.memory_space<vmem>>, vector<16x32xbf16>,
    return
  }
  func.func @transform_0(%arg0: i32, %arg1: i32) -> (i32, i32) {
    %c0_i32 = arith.constant 0 : i32
    %c0_i32_0 = arith.constant 0 : i32
    return %arg1, %c0_i32 : i32, i32
  }
  func.func @transform_1(%arg0: i32, %arg1: i32) -> (i32, i32) {
    %c0_i32 = arith.constant 0 : i32
    %c0_i32_0 = arith.constant 0 : i32
    return %c0_i32, %arg0 : i32, i32
  }
  func.func @transform_2(%arg0: i32, %arg1: i32) -> (i32, i32) {
    %c0_i32 = arith.constant 0 : i32
    %c0_i32_0 = arith.constant 0 : i32
    return %c0_i32, %arg0 : i32, i32
  }
  func.func @transform_3(%arg0: i32, %arg1: i32) -> (i32, i32) {
    %c0_i32 = arith.constant 0 : i32
    return %arg1, %arg0 : i32, i32
  }
}

module attributes {stable_mosaic.version = 11 : i64} {
  func.func @_proj_add_ln_kernel(%arg0: i32, %arg1: memref<1x8x32xbf16, #tpu.memory_space<vmem>>, %arg2: memref<32x32xbf16, #tpu.memory_space<vmem>>, %arg3: memref<1x32xf32, #tpu.memory_space<vmem>>, %arg4: memref<1x8x32xbf16, #tpu.memory_space<vmem>>, %arg5: memref<1x8x32xbf16, #tpu.memory_space<vmem>>) attributes {dimension_semantics = [#tpu.dimension_semantics<parallel>], iteration_bounds = array<i64: 2>, scalar_prefetch = 0 : i64, scratch_operands = 0 : i64, tpu.core_type = #tpu.core_type<tc>, window_params = [{transform_indices = @transform_0, window_bounds = array<i64: 1, 8, 32>}, {pipeline_mode = #tpu.pipeline_mode<synchronous>, transform_indices = @transform_1, window_bounds = array<i64: 32, 32>}, {pipeline_mode = #tpu.pipeline_mode<synchronous>, transform_indices = @transform_2, window_bounds = array<i64: 1, 32>}, {transform_indices = @transform_3, window_bounds = array<i64: 1, 8, 32>}, {transform_indices = @transform_4, window_bounds = array<i64: 1, 8, 32>}]} {
    %c0 = arith.constant 0 : index
    %c0_0 = arith.constant 0 : index
    %c0_1 = arith.constant 0 : index
    %0 = vector.load %arg1[%c0, %c0_0, %c0_1] : memref<1x8x32xbf16, #tpu.memory_space<vmem>>, vector<1x8x32xbf16>
    %1 = vector.shape_cast %0 : vector<1x8x32xbf16> to vector<8x32xbf16>
    %c0_2 = arith.constant 0 : index
    %c0_3 = arith.constant 0 : index
    %2 = vector.load %arg2[%c0_2, %c0_3] : memref<32x32xbf16, #tpu.memory_space<vmem>>, vector<32x32xbf16>
    %cst = arith.constant dense<0.000000e+00> : vector<8x32xf32>
    %3 = tpu.matmul %1, %2, %cst {dimension_numbers = #tpu.dot_dimension_numbers<[1], [0], [0], [1], [0, 0, 1, 1], [], []>} : vector<8x32xbf16>, vector<32x32xbf16>, vector<8x32xf32> -> vector<8x32xf32>
    %c0_4 = arith.constant 0 : index
    %c0_5 = arith.constant 0 : index
    %4 = vector.load %arg3[%c0_4, %c0_5] : memref<1x32xf32, #tpu.memory_space<vmem>>, vector<1x32xf32>
    %5 = vector.broadcast %4 : vector<1x32xf32> to vector<8x32xf32>
    %6 = arith.addf %3, %5 : vector<8x32xf32>
    %c0_6 = arith.constant 0 : index
    %c0_7 = arith.constant 0 : index
    %c0_8 = arith.constant 0 : index
    %7 = vector.load %arg4[%c0_6, %c0_7, %c0_8] : memref<1x8x32xbf16, #tpu.memory_space<vmem>>, vector<1x8x32xbf16>
    %8 = vector.shape_cast %7 : vector<1x8x32xbf16> to vector<8x32xbf16>
    %9 = arith.extf %8 : vector<8x32xbf16> to vector<8x32xf32>
    %10 = arith.addf %6, %9 : vector<8x32xf32>
    %11 = vector.shape_cast %10 : vector<8x32xf32> to vector<1x8x32xf32>
    %cst_9 = arith.constant dense<0.000000e+00> : vector<1xf32>
    %12 = vector.multi_reduction <add>, %11, %cst_9 [1, 2] : vector<1x8x32xf32> to vector<1xf32>
    %13 = vector.shape_cast %12 : vector<1xf32> to vector<1x1x1xf32>
    %14 = vector.extract %13[0, 0, 0] : f32 from vector<1x1x1xf32>
    %15 = vector.broadcast %14 : f32 to vector<1x1xf32>
    %cst_10 = arith.constant 2.560000e+02 : f32
    %16 = vector.broadcast %cst_10 : f32 to vector<1x1xf32>
    %17 = arith.divf %15, %16 : vector<1x1xf32>
    %18 = vector.broadcast %17 : vector<1x1xf32> to vector<8x32xf32>
    %19 = arith.subf %10, %18 : vector<8x32xf32>
    %20 = arith.mulf %19, %19 : vector<8x32xf32>
    %21 = vector.shape_cast %20 : vector<8x32xf32> to vector<1x8x32xf32>
    %cst_11 = arith.constant dense<0.000000e+00> : vector<1xf32>
    %22 = vector.multi_reduction <add>, %21, %cst_11 [1, 2] : vector<1x8x32xf32> to vector<1xf32>
    %23 = vector.shape_cast %22 : vector<1xf32> to vector<1x1x1xf32>
    %24 = vector.extract %23[0, 0, 0] : f32 from vector<1x1x1xf32>
    %25 = vector.broadcast %24 : f32 to vector<1x1xf32>
    %cst_12 = arith.constant 2.560000e+02 : f32
    %26 = vector.broadcast %cst_12 : f32 to vector<1x1xf32>
    %27 = arith.divf %25, %26 : vector<1x1xf32>
    %28 = vector.broadcast %17 : vector<1x1xf32> to vector<8x32xf32>
    %29 = arith.subf %10, %28 : vector<8x32xf32>
    %cst_13 = arith.constant 9.99999974E-6 : f32
    %30 = vector.broadcast %cst_13 : f32 to vector<1x1xf32>
    %31 = arith.addf %27, %30 : vector<1x1xf32>
    %32 = math.rsqrt %31 : vector<1x1xf32>
    %33 = vector.broadcast %32 : vector<1x1xf32> to vector<8x32xf32>
    %34 = arith.mulf %29, %33 : vector<8x32xf32>
    %35 = arith.truncf %34 : vector<8x32xf32> to vector<8x32xbf16>
    %c0_14 = arith.constant 0 : index
    %c0_15 = arith.constant 0 : index
    %c0_16 = arith.constant 0 : index
    %36 = vector.load %arg5[%c0_14, %c0_15, %c0_16] : memref<1x8x32xbf16, #tpu.memory_space<vmem>>, vector<1x8x32xbf16>
    %37 = vector.shape_cast %36 : vector<1x8x32xbf16> to vector<8x32xbf16>
    %38 = vector.shape_cast %35 : vector<8x32xbf16> to vector<1x8x32xbf16>
    tpu.vector_store %arg5[%c0_14, %c0_15, %c0_16], %38 {strides = array<i32>} : memref<1x8x32xbf16, #tpu.memory_space<vmem>>, vector<1x8x32xbf16>,
    return
  }
  func.func @transform_0(%arg0: i32) -> (i32, i32, i32) {
    %c0_i32 = arith.constant 0 : i32
    %c0_i32_0 = arith.constant 0 : i32
    %c0_i32_1 = arith.constant 0 : i32
    return %arg0, %c0_i32, %c0_i32_0 : i32, i32, i32
  }
  func.func @transform_1(%arg0: i32) -> (i32, i32) {
    %c0_i32 = arith.constant 0 : i32
    %c0_i32_0 = arith.constant 0 : i32
    %c0_i32_1 = arith.constant 0 : i32
    return %c0_i32, %c0_i32_0 : i32, i32
  }
  func.func @transform_2(%arg0: i32) -> (i32, i32) {
    %c0_i32 = arith.constant 0 : i32
    %c0_i32_0 = arith.constant 0 : i32
    %c0_i32_1 = arith.constant 0 : i32
    return %c0_i32, %c0_i32_0 : i32, i32
  }
  func.func @transform_3(%arg0: i32) -> (i32, i32, i32) {
    %c0_i32 = arith.constant 0 : i32
    %c0_i32_0 = arith.constant 0 : i32
    %c0_i32_1 = arith.constant 0 : i32
    return %arg0, %c0_i32, %c0_i32_0 : i32, i32, i32
  }
  func.func @transform_4(%arg0: i32) -> (i32, i32, i32) {
    %c0_i32 = arith.constant 0 : i32
    %c0_i32_0 = arith.constant 0 : i32
    %c0_i32_1 = arith.constant 0 : i32
    return %arg0, %c0_i32, %c0_i32_0 : i32, i32, i32
  }
}

module attributes {stable_mosaic.version = 11 : i64} {
  func.func @_cross_attn_kernel(%arg0: i32, %arg1: memref<1x8x32xbf16, #tpu.memory_space<vmem>>, %arg2: memref<1x8x64xbf16, #tpu.memory_space<vmem>>, %arg3: memref<1x32x8xbf16, #tpu.memory_space<vmem>>) attributes {dimension_semantics = [#tpu.dimension_semantics<parallel>], iteration_bounds = array<i64: 2>, scalar_prefetch = 0 : i64, scratch_operands = 0 : i64, tpu.core_type = #tpu.core_type<tc>, window_params = [{transform_indices = @transform_0, window_bounds = array<i64: 1, 8, 32>}, {transform_indices = @transform_1, window_bounds = array<i64: 1, 8, 64>}, {transform_indices = @transform_2, window_bounds = array<i64: 1, 32, 8>}]} {
    %c0 = arith.constant 0 : index
    %c0_0 = arith.constant 0 : index
    %c0_1 = arith.constant 0 : index
    %0 = vector.load %arg2[%c0, %c0_0, %c0_1] : memref<1x8x64xbf16, #tpu.memory_space<vmem>>, vector<1x8x64xbf16>
    %1 = vector.shape_cast %0 : vector<1x8x64xbf16> to vector<8x64xbf16>
    %c0_2 = arith.constant 0 : index
    %c0_3 = arith.constant 0 : index
    %c0_4 = arith.constant 0 : index
    %2 = vector.load %arg1[%c0_2, %c0_3, %c0_4] : memref<1x8x32xbf16, #tpu.memory_space<vmem>>, vector<1x8x32xbf16>
    %3 = vector.shape_cast %2 : vector<1x8x32xbf16> to vector<8x32xbf16>
    %4 = vector.extract_strided_slice %1 {offsets = [0, 0], sizes = [8, 32], strides = [1, 1]} : vector<8x64xbf16> to vector<8x32xbf16>
    %5 = vector.extract_strided_slice %1 {offsets = [0, 32], sizes = [8, 32], strides = [1, 1]} : vector<8x64xbf16> to vector<8x32xbf16>
    %6 = vector.extract_strided_slice %3 {offsets = [0, 0], sizes = [8, 8], strides = [1, 1]} : vector<8x32xbf16> to vector<8x8xbf16>
    %7 = vector.extract_strided_slice %4 {offsets = [0, 0], sizes = [8, 8], strides = [1, 1]} : vector<8x32xbf16> to vector<8x8xbf16>
    %8 = vector.extract_strided_slice %5 {offsets = [0, 0], sizes = [8, 8], strides = [1, 1]} : vector<8x32xbf16> to vector<8x8xbf16>
    %cst = arith.constant dense<0.000000e+00> : vector<8x8xf32>
    %9 = tpu.matmul %6, %7, %cst {dimension_numbers = #tpu.dot_dimension_numbers<[1], [1], [0], [0], [0, 0, 1, 0], [], []>} : vector<8x8xbf16>, vector<8x8xbf16>, vector<8x8xf32> -> vector<8x8xf32>
    %cst_5 = arith.constant 0.353553385 : f32
    %10 = vector.broadcast %cst_5 : f32 to vector<8x8xf32>
    %11 = arith.mulf %9, %10 : vector<8x8xf32>
    %cst_6 = arith.constant dense<0xFF800000> : vector<8xf32>
    %12 = vector.multi_reduction <maximumf>, %11, %cst_6 [1] : vector<8x8xf32> to vector<8xf32>
    %13 = vector.shape_cast %12 : vector<8xf32> to vector<8x1xf32>
    %14 = vector.broadcast %13 : vector<8x1xf32> to vector<8x8xf32>
    %15 = arith.subf %11, %14 : vector<8x8xf32>
    %16 = math.exp %15 : vector<8x8xf32>
    %cst_7 = arith.constant dense<0.000000e+00> : vector<8xf32>
    %17 = vector.multi_reduction <add>, %16, %cst_7 [1] : vector<8x8xf32> to vector<8xf32>
    %18 = vector.shape_cast %17 : vector<8xf32> to vector<8x1xf32>
    %19 = tpu.reciprocal %18 {approx = true} : vector<8x1xf32> -> vector<8x1xf32>
    %20 = vector.broadcast %19 : vector<8x1xf32> to vector<8x8xf32>
    %21 = arith.mulf %16, %20 : vector<8x8xf32>
    %22 = arith.truncf %21 : vector<8x8xf32> to vector<8x8xbf16>
    %cst_8 = arith.constant dense<0.000000e+00> : vector<8x8xf32>
    %23 = tpu.matmul %8, %22, %cst_8 {dimension_numbers = #tpu.dot_dimension_numbers<[0], [1], [1], [0], [0, 1, 1, 0], [], []>} : vector<8x8xbf16>, vector<8x8xbf16>, vector<8x8xf32> -> vector<8x8xf32>
    %24 = vector.extract_strided_slice %3 {offsets = [0, 8], sizes = [8, 8], strides = [1, 1]} : vector<8x32xbf16> to vector<8x8xbf16>
    %25 = vector.extract_strided_slice %4 {offsets = [0, 8], sizes = [8, 8], strides = [1, 1]} : vector<8x32xbf16> to vector<8x8xbf16>
    %26 = vector.extract_strided_slice %5 {offsets = [0, 8], sizes = [8, 8], strides = [1, 1]} : vector<8x32xbf16> to vector<8x8xbf16>
    %cst_9 = arith.constant dense<0.000000e+00> : vector<8x8xf32>
    %27 = tpu.matmul %24, %25, %cst_9 {dimension_numbers = #tpu.dot_dimension_numbers<[1], [1], [0], [0], [0, 0, 1, 0], [], []>} : vector<8x8xbf16>, vector<8x8xbf16>, vector<8x8xf32> -> vector<8x8xf32>
    %cst_10 = arith.constant 0.353553385 : f32
    %28 = vector.broadcast %cst_10 : f32 to vector<8x8xf32>
    %29 = arith.mulf %27, %28 : vector<8x8xf32>
    %cst_11 = arith.constant dense<0xFF800000> : vector<8xf32>
    %30 = vector.multi_reduction <maximumf>, %29, %cst_11 [1] : vector<8x8xf32> to vector<8xf32>
    %31 = vector.shape_cast %30 : vector<8xf32> to vector<8x1xf32>
    %32 = vector.broadcast %31 : vector<8x1xf32> to vector<8x8xf32>
    %33 = arith.subf %29, %32 : vector<8x8xf32>
    %34 = math.exp %33 : vector<8x8xf32>
    %cst_12 = arith.constant dense<0.000000e+00> : vector<8xf32>
    %35 = vector.multi_reduction <add>, %34, %cst_12 [1] : vector<8x8xf32> to vector<8xf32>
    %36 = vector.shape_cast %35 : vector<8xf32> to vector<8x1xf32>
    %37 = tpu.reciprocal %36 {approx = true} : vector<8x1xf32> -> vector<8x1xf32>
    %38 = vector.broadcast %37 : vector<8x1xf32> to vector<8x8xf32>
    %39 = arith.mulf %34, %38 : vector<8x8xf32>
    %40 = arith.truncf %39 : vector<8x8xf32> to vector<8x8xbf16>
    %cst_13 = arith.constant dense<0.000000e+00> : vector<8x8xf32>
    %41 = tpu.matmul %26, %40, %cst_13 {dimension_numbers = #tpu.dot_dimension_numbers<[0], [1], [1], [0], [0, 1, 1, 0], [], []>} : vector<8x8xbf16>, vector<8x8xbf16>, vector<8x8xf32> -> vector<8x8xf32>
    %42 = vector.extract_strided_slice %3 {offsets = [0, 16], sizes = [8, 8], strides = [1, 1]} : vector<8x32xbf16> to vector<8x8xbf16>
    %43 = vector.extract_strided_slice %4 {offsets = [0, 16], sizes = [8, 8], strides = [1, 1]} : vector<8x32xbf16> to vector<8x8xbf16>
    %44 = vector.extract_strided_slice %5 {offsets = [0, 16], sizes = [8, 8], strides = [1, 1]} : vector<8x32xbf16> to vector<8x8xbf16>
    %cst_14 = arith.constant dense<0.000000e+00> : vector<8x8xf32>
    %45 = tpu.matmul %42, %43, %cst_14 {dimension_numbers = #tpu.dot_dimension_numbers<[1], [1], [0], [0], [0, 0, 1, 0], [], []>} : vector<8x8xbf16>, vector<8x8xbf16>, vector<8x8xf32> -> vector<8x8xf32>
    %cst_15 = arith.constant 0.353553385 : f32
    %46 = vector.broadcast %cst_15 : f32 to vector<8x8xf32>
    %47 = arith.mulf %45, %46 : vector<8x8xf32>
    %cst_16 = arith.constant dense<0xFF800000> : vector<8xf32>
    %48 = vector.multi_reduction <maximumf>, %47, %cst_16 [1] : vector<8x8xf32> to vector<8xf32>
    %49 = vector.shape_cast %48 : vector<8xf32> to vector<8x1xf32>
    %50 = vector.broadcast %49 : vector<8x1xf32> to vector<8x8xf32>
    %51 = arith.subf %47, %50 : vector<8x8xf32>
    %52 = math.exp %51 : vector<8x8xf32>
    %cst_17 = arith.constant dense<0.000000e+00> : vector<8xf32>
    %53 = vector.multi_reduction <add>, %52, %cst_17 [1] : vector<8x8xf32> to vector<8xf32>
    %54 = vector.shape_cast %53 : vector<8xf32> to vector<8x1xf32>
    %55 = tpu.reciprocal %54 {approx = true} : vector<8x1xf32> -> vector<8x1xf32>
    %56 = vector.broadcast %55 : vector<8x1xf32> to vector<8x8xf32>
    %57 = arith.mulf %52, %56 : vector<8x8xf32>
    %58 = arith.truncf %57 : vector<8x8xf32> to vector<8x8xbf16>
    %cst_18 = arith.constant dense<0.000000e+00> : vector<8x8xf32>
    %59 = tpu.matmul %44, %58, %cst_18 {dimension_numbers = #tpu.dot_dimension_numbers<[0], [1], [1], [0], [0, 1, 1, 0], [], []>} : vector<8x8xbf16>, vector<8x8xbf16>, vector<8x8xf32> -> vector<8x8xf32>
    %60 = vector.extract_strided_slice %3 {offsets = [0, 24], sizes = [8, 8], strides = [1, 1]} : vector<8x32xbf16> to vector<8x8xbf16>
    %61 = vector.extract_strided_slice %4 {offsets = [0, 24], sizes = [8, 8], strides = [1, 1]} : vector<8x32xbf16> to vector<8x8xbf16>
    %62 = vector.extract_strided_slice %5 {offsets = [0, 24], sizes = [8, 8], strides = [1, 1]} : vector<8x32xbf16> to vector<8x8xbf16>
    %cst_19 = arith.constant dense<0.000000e+00> : vector<8x8xf32>
    %63 = tpu.matmul %60, %61, %cst_19 {dimension_numbers = #tpu.dot_dimension_numbers<[1], [1], [0], [0], [0, 0, 1, 0], [], []>} : vector<8x8xbf16>, vector<8x8xbf16>, vector<8x8xf32> -> vector<8x8xf32>
    %cst_20 = arith.constant 0.353553385 : f32
    %64 = vector.broadcast %cst_20 : f32 to vector<8x8xf32>
    %65 = arith.mulf %63, %64 : vector<8x8xf32>
    %cst_21 = arith.constant dense<0xFF800000> : vector<8xf32>
    %66 = vector.multi_reduction <maximumf>, %65, %cst_21 [1] : vector<8x8xf32> to vector<8xf32>
    %67 = vector.shape_cast %66 : vector<8xf32> to vector<8x1xf32>
    %68 = vector.broadcast %67 : vector<8x1xf32> to vector<8x8xf32>
    %69 = arith.subf %65, %68 : vector<8x8xf32>
    %70 = math.exp %69 : vector<8x8xf32>
    %cst_22 = arith.constant dense<0.000000e+00> : vector<8xf32>
    %71 = vector.multi_reduction <add>, %70, %cst_22 [1] : vector<8x8xf32> to vector<8xf32>
    %72 = vector.shape_cast %71 : vector<8xf32> to vector<8x1xf32>
    %73 = tpu.reciprocal %72 {approx = true} : vector<8x1xf32> -> vector<8x1xf32>
    %74 = vector.broadcast %73 : vector<8x1xf32> to vector<8x8xf32>
    %75 = arith.mulf %70, %74 : vector<8x8xf32>
    %76 = arith.truncf %75 : vector<8x8xf32> to vector<8x8xbf16>
    %cst_23 = arith.constant dense<0.000000e+00> : vector<8x8xf32>
    %77 = tpu.matmul %62, %76, %cst_23 {dimension_numbers = #tpu.dot_dimension_numbers<[0], [1], [1], [0], [0, 1, 1, 0], [], []>} : vector<8x8xbf16>, vector<8x8xbf16>, vector<8x8xf32> -> vector<8x8xf32>
    %78 = tpu.concatenate %23, %41, %59, %77 in 0 : vector<8x8xf32>, vector<8x8xf32>, vector<8x8xf32>, vector<8x8xf32> -> vector<32x8xf32>
    %79 = arith.truncf %78 : vector<32x8xf32> to vector<32x8xbf16>
    %c0_24 = arith.constant 0 : index
    %c0_25 = arith.constant 0 : index
    %c0_26 = arith.constant 0 : index
    %80 = vector.load %arg3[%c0_24, %c0_25, %c0_26] : memref<1x32x8xbf16, #tpu.memory_space<vmem>>, vector<1x32x8xbf16>
    %81 = vector.shape_cast %80 : vector<1x32x8xbf16> to vector<32x8xbf16>
    %82 = vector.shape_cast %79 : vector<32x8xbf16> to vector<1x32x8xbf16>
    tpu.vector_store %arg3[%c0_24, %c0_25, %c0_26], %82 {strides = array<i32>} : memref<1x32x8xbf16, #tpu.memory_space<vmem>>, vector<1x32x8xbf16>,
    return
  }
  func.func @transform_0(%arg0: i32) -> (i32, i32, i32) {
    %c0_i32 = arith.constant 0 : i32
    %c0_i32_0 = arith.constant 0 : i32
    %c0_i32_1 = arith.constant 0 : i32
    return %arg0, %c0_i32, %c0_i32_0 : i32, i32, i32
  }
  func.func @transform_1(%arg0: i32) -> (i32, i32, i32) {
    %c0_i32 = arith.constant 0 : i32
    %c0_i32_0 = arith.constant 0 : i32
    %c0_i32_1 = arith.constant 0 : i32
    return %arg0, %c0_i32, %c0_i32_0 : i32, i32, i32
  }
  func.func @transform_2(%arg0: i32) -> (i32, i32, i32) {
    %c0_i32 = arith.constant 0 : i32
    %c0_i32_0 = arith.constant 0 : i32
    %c0_i32_1 = arith.constant 0 : i32
    return %arg0, %c0_i32, %c0_i32_0 : i32, i32, i32
  }
}

module attributes {stable_mosaic.version = 11 : i64} {
  func.func @_ffn_add_ln_kernel(%arg0: i32, %arg1: i32, %arg2: memref<1x8x32xbf16, #tpu.memory_space<vmem>>, %arg3: memref<32x64xbf16, #tpu.memory_space<vmem>>, %arg4: memref<1x64xf32, #tpu.memory_space<vmem>>, %arg5: memref<64x32xbf16, #tpu.memory_space<vmem>>, %arg6: memref<1x32xf32, #tpu.memory_space<vmem>>, %arg7: memref<1x8x32xbf16, #tpu.memory_space<vmem>>, %arg8: memref<8x32xf32, #tpu.memory_space<vmem>>) attributes {dimension_semantics = [#tpu.dimension_semantics<parallel>, #tpu.dimension_semantics<arbitrary>], iteration_bounds = array<i64: 2, 1>, scalar_prefetch = 0 : i64, scratch_operands = 1 : i64, tpu.core_type = #tpu.core_type<tc>, window_params = [{transform_indices = @transform_0, window_bounds = array<i64: 1, 8, 32>}, {transform_indices = @transform_1, window_bounds = array<i64: 32, 64>}, {transform_indices = @transform_2, window_bounds = array<i64: 1, 64>}, {transform_indices = @transform_3, window_bounds = array<i64: 64, 32>}, {pipeline_mode = #tpu.pipeline_mode<synchronous>, transform_indices = @transform_4, window_bounds = array<i64: 1, 32>}, {transform_indices = @transform_5, window_bounds = array<i64: 1, 8, 32>}]} {
    %c0_i32 = arith.constant 0 : i32
    %0 = arith.cmpi eq, %arg1, %c0_i32 : i32
    %1 = arith.extui %0 : i1 to i32
    %c0_i32_0 = arith.constant 0 : i32
    %2 = arith.cmpi ne, %1, %c0_i32_0 : i32
    scf.if %2 {
      %cst_17 = arith.constant 0.000000e+00 : f32
      %21 = vector.broadcast %cst_17 : f32 to vector<8x32xf32>
      %c0_18 = arith.constant 0 : index
      %c0_19 = arith.constant 0 : index
      %22 = vector.load %arg8[%c0_18, %c0_19] : memref<8x32xf32, #tpu.memory_space<vmem>>, vector<8x32xf32>
      tpu.vector_store %arg8[%c0_18, %c0_19], %21 {strides = array<i32>} : memref<8x32xf32, #tpu.memory_space<vmem>>, vector<8x32xf32>,
    } else {
    }
    %c0 = arith.constant 0 : index
    %c0_1 = arith.constant 0 : index
    %c0_2 = arith.constant 0 : index
    %3 = vector.load %arg2[%c0, %c0_1, %c0_2] : memref<1x8x32xbf16, #tpu.memory_space<vmem>>, vector<1x8x32xbf16>
    %4 = vector.shape_cast %3 : vector<1x8x32xbf16> to vector<8x32xbf16>
    %c0_3 = arith.constant 0 : index
    %c0_4 = arith.constant 0 : index
    %5 = vector.load %arg3[%c0_3, %c0_4] : memref<32x64xbf16, #tpu.memory_space<vmem>>, vector<32x64xbf16>
    %cst = arith.constant dense<0.000000e+00> : vector<8x64xf32>
    %6 = tpu.matmul %4, %5, %cst {dimension_numbers = #tpu.dot_dimension_numbers<[1], [0], [0], [1], [0, 0, 1, 1], [], []>} : vector<8x32xbf16>, vector<32x64xbf16>, vector<8x64xf32> -> vector<8x64xf32>
    %c0_5 = arith.constant 0 : index
    %c0_6 = arith.constant 0 : index
    %7 = vector.load %arg4[%c0_5, %c0_6] : memref<1x64xf32, #tpu.memory_space<vmem>>, vector<1x64xf32>
    %8 = vector.broadcast %7 : vector<1x64xf32> to vector<8x64xf32>
    %9 = arith.addf %6, %8 : vector<8x64xf32>
    %cst_7 = arith.constant 0.000000e+00 : f32
    %10 = vector.broadcast %cst_7 : f32 to vector<8x64xf32>
    %11 = arith.maximumf %9, %10 : vector<8x64xf32>
    %c0_8 = arith.constant 0 : index
    %c0_9 = arith.constant 0 : index
    %12 = vector.load %arg8[%c0_8, %c0_9] : memref<8x32xf32, #tpu.memory_space<vmem>>, vector<8x32xf32>
    %13 = arith.truncf %11 : vector<8x64xf32> to vector<8x64xbf16>
    %c0_10 = arith.constant 0 : index
    %c0_11 = arith.constant 0 : index
    %14 = vector.load %arg5[%c0_10, %c0_11] : memref<64x32xbf16, #tpu.memory_space<vmem>>, vector<64x32xbf16>
    %cst_12 = arith.constant dense<0.000000e+00> : vector<8x32xf32>
    %15 = tpu.matmul %13, %14, %cst_12 {dimension_numbers = #tpu.dot_dimension_numbers<[1], [0], [0], [1], [0, 0, 1, 1], [], []>} : vector<8x64xbf16>, vector<64x32xbf16>, vector<8x32xf32> -> vector<8x32xf32>
    %16 = arith.addf %12, %15 : vector<8x32xf32>
    %c0_13 = arith.constant 0 : index
    %c0_14 = arith.constant 0 : index
    %17 = vector.load %arg8[%c0_13, %c0_14] : memref<8x32xf32, #tpu.memory_space<vmem>>, vector<8x32xf32>
    tpu.vector_store %arg8[%c0_13, %c0_14], %16 {strides = array<i32>} : memref<8x32xf32, #tpu.memory_space<vmem>>, vector<8x32xf32>,
    %c0_i32_15 = arith.constant 0 : i32
    %18 = arith.cmpi eq, %arg1, %c0_i32_15 : i32
    %19 = arith.extui %18 : i1 to i32
    %c0_i32_16 = arith.constant 0 : i32
    %20 = arith.cmpi ne, %19, %c0_i32_16 : i32
    scf.if %20 {
      %c0_17 = arith.constant 0 : index
      %c0_18 = arith.constant 0 : index
      %21 = vector.load %arg8[%c0_17, %c0_18] : memref<8x32xf32, #tpu.memory_space<vmem>>, vector<8x32xf32>
      %c0_19 = arith.constant 0 : index
      %c0_20 = arith.constant 0 : index
      %22 = vector.load %arg6[%c0_19, %c0_20] : memref<1x32xf32, #tpu.memory_space<vmem>>, vector<1x32xf32>
      %23 = vector.broadcast %22 : vector<1x32xf32> to vector<8x32xf32>
      %24 = arith.addf %21, %23 : vector<8x32xf32>
      %c0_21 = arith.constant 0 : index
      %c0_22 = arith.constant 0 : index
      %c0_23 = arith.constant 0 : index
      %25 = vector.load %arg2[%c0_21, %c0_22, %c0_23] : memref<1x8x32xbf16, #tpu.memory_space<vmem>>, vector<1x8x32xbf16>
      %26 = vector.shape_cast %25 : vector<1x8x32xbf16> to vector<8x32xbf16>
      %27 = arith.extf %26 : vector<8x32xbf16> to vector<8x32xf32>
      %28 = arith.addf %24, %27 : vector<8x32xf32>
      %29 = vector.shape_cast %28 : vector<8x32xf32> to vector<1x8x32xf32>
      %cst_24 = arith.constant dense<0.000000e+00> : vector<1xf32>
      %30 = vector.multi_reduction <add>, %29, %cst_24 [1, 2] : vector<1x8x32xf32> to vector<1xf32>
      %31 = vector.shape_cast %30 : vector<1xf32> to vector<1x1x1xf32>
      %32 = vector.extract %31[0, 0, 0] : f32 from vector<1x1x1xf32>
      %33 = vector.broadcast %32 : f32 to vector<1x1xf32>
      %cst_25 = arith.constant 2.560000e+02 : f32
      %34 = vector.broadcast %cst_25 : f32 to vector<1x1xf32>
      %35 = arith.divf %33, %34 : vector<1x1xf32>
      %36 = vector.broadcast %35 : vector<1x1xf32> to vector<8x32xf32>
      %37 = arith.subf %28, %36 : vector<8x32xf32>
      %38 = arith.mulf %37, %37 : vector<8x32xf32>
      %39 = vector.shape_cast %38 : vector<8x32xf32> to vector<1x8x32xf32>
      %cst_26 = arith.constant dense<0.000000e+00> : vector<1xf32>
      %40 = vector.multi_reduction <add>, %39, %cst_26 [1, 2] : vector<1x8x32xf32> to vector<1xf32>
      %41 = vector.shape_cast %40 : vector<1xf32> to vector<1x1x1xf32>
      %42 = vector.extract %41[0, 0, 0] : f32 from vector<1x1x1xf32>
      %43 = vector.broadcast %42 : f32 to vector<1x1xf32>
      %cst_27 = arith.constant 2.560000e+02 : f32
      %44 = vector.broadcast %cst_27 : f32 to vector<1x1xf32>
      %45 = arith.divf %43, %44 : vector<1x1xf32>
      %46 = vector.broadcast %35 : vector<1x1xf32> to vector<8x32xf32>
      %47 = arith.subf %28, %46 : vector<8x32xf32>
      %cst_28 = arith.constant 9.99999974E-6 : f32
      %48 = vector.broadcast %cst_28 : f32 to vector<1x1xf32>
      %49 = arith.addf %45, %48 : vector<1x1xf32>
      %50 = math.rsqrt %49 : vector<1x1xf32>
      %51 = vector.broadcast %50 : vector<1x1xf32> to vector<8x32xf32>
      %52 = arith.mulf %47, %51 : vector<8x32xf32>
      %53 = arith.truncf %52 : vector<8x32xf32> to vector<8x32xbf16>
      %c0_29 = arith.constant 0 : index
      %c0_30 = arith.constant 0 : index
      %c0_31 = arith.constant 0 : index
      %54 = vector.load %arg7[%c0_29, %c0_30, %c0_31] : memref<1x8x32xbf16, #tpu.memory_space<vmem>>, vector<1x8x32xbf16>
      %55 = vector.shape_cast %54 : vector<1x8x32xbf16> to vector<8x32xbf16>
      %56 = vector.shape_cast %53 : vector<8x32xbf16> to vector<1x8x32xbf16>
      tpu.vector_store %arg7[%c0_29, %c0_30, %c0_31], %56 {strides = array<i32>} : memref<1x8x32xbf16, #tpu.memory_space<vmem>>, vector<1x8x32xbf16>,
    } else {
    }
    return
  }
  func.func @transform_0(%arg0: i32, %arg1: i32) -> (i32, i32, i32) {
    %c0_i32 = arith.constant 0 : i32
    %c0_i32_0 = arith.constant 0 : i32
    %c0_i32_1 = arith.constant 0 : i32
    return %arg0, %c0_i32, %c0_i32_0 : i32, i32, i32
  }
  func.func @transform_1(%arg0: i32, %arg1: i32) -> (i32, i32) {
    %c0_i32 = arith.constant 0 : i32
    %c0_i32_0 = arith.constant 0 : i32
    return %c0_i32, %arg1 : i32, i32
  }
  func.func @transform_2(%arg0: i32, %arg1: i32) -> (i32, i32) {
    %c0_i32 = arith.constant 0 : i32
    %c0_i32_0 = arith.constant 0 : i32
    return %c0_i32, %arg1 : i32, i32
  }
  func.func @transform_3(%arg0: i32, %arg1: i32) -> (i32, i32) {
    %c0_i32 = arith.constant 0 : i32
    %c0_i32_0 = arith.constant 0 : i32
    return %arg1, %c0_i32 : i32, i32
  }
  func.func @transform_4(%arg0: i32, %arg1: i32) -> (i32, i32) {
    %c0_i32 = arith.constant 0 : i32
    %c0_i32_0 = arith.constant 0 : i32
    %c0_i32_1 = arith.constant 0 : i32
    return %c0_i32, %c0_i32_0 : i32, i32
  }
  func.func @transform_5(%arg0: i32, %arg1: i32) -> (i32, i32, i32) {
    %c0_i32 = arith.constant 0 : i32
    %c0_i32_0 = arith.constant 0 : i32
    %c0_i32_1 = arith.constant 0 : i32
    return %arg0, %c0_i32, %c0_i32_0 : i32, i32, i32
  }
}

</mosaic_0001>

<bundles_post_ra>
// kernel: decoder.28
= control target key start
LH: loop header
LB: loop body
LE: loop exit
PB: predicated region body
PF: predicated region fallthrough
CT: control target
= control target key end

     0   :  { %vm42_vm0 = vcmask 261120   ;;  %vm62_vm1 = vcmask 519168   ;;  %s124_s1 = inlined_call_operand.vmem [shape: bf16[32,64], index: 1, kind: input, shape index: {}]   ;;  %s125_s2 = inlined_call_operand.vmem [shape: f32[1,64], index: 2, kind: input, shape index: {}]   ;;  %s126_s0 = inlined_call_operand.vmem [shape: bf16[16,32], index: 0, kind: input, shape index: {}]   ;;  %s127_s3 = inlined_call_operand.vmem [shape: bf16[16,64], index: 3, kind: output, shape index: {}]  }
   0x1   :  { %v84_v0 = vld [vmem:[%s124_s1 + $0x8] sm:$0xff]  ;;  %v83_v1 = vld [vmem:[%s124_s1] sm:$0xff] }
   0x2   :  { %52 = vmatpush.bf16.msra.mxu0 %v84_v0  ;;  %v82_v2 = vld [vmem:[%s126_s0] sm:$0xff] }
   0x3   :  { %v85_v3 = vld [vmem:[%s125_s2] ss:$0 sm:$0xff] }
   0x6   :  { %53 = vmatpush.bf16.msra.mxu0 %v83_v1 }
   0x9   :  { %81 = vmatmul.msk.bf16.vlgmr.msra.gmra.mxu0 %vm42_vm0, %v82_v2 }
  0x86   :  { %v55_v4 = vpop.f32.mrf.mxu0 }
  0x87   :  { %v56_v5 = vadd.f32 %v85_v3, %v55_v4 }
  0x89   :  { %v60_v6 = vpack.c.bf16 %v56_v5, %v56_v5 }
  0x8b   :  { %63 = vst.msk [vmem:[%s127_s3] sm:$0xf] %vm62_vm1, %v60_v6 }
  0x8e   :  { %v57_v7 = vpop.f32.mrf.mxu0 }
  0x8f   :  { %v58_v8 = vadd.f32 %v85_v3, %v57_v7 }
  0x91   :  { %v61_v9 = vpack.c.bf16 %v58_v8, %v58_v8 }
  0x93   :  { %64 = vst.msk [vmem:[%s127_s3 + $0x4] sm:$0xf] %vm62_vm1, %v61_v9 }

// kernel: decoder.20
= control target key start
LH: loop header
LB: loop body
LE: loop exit
PB: predicated region body
PF: predicated region fallthrough
CT: control target
= control target key end

     0   :  { %8 = vsyncpa [#allocation3], 0  ;;  %s213_s0 = inlined_call_operand.vmem [shape: bf16[16,32], index: 0, kind: input, shape index: {}]   ;;  %s214_s1 = inlined_call_operand.hbm [shape: bf16[32,64], index: 1, kind: input, shape index: {}]   ;;  %s215_s2 = inlined_call_operand.hbm [shape: f32[1,64], index: 2, kind: input, shape index: {}]   ;;  %s216_s3 = inlined_call_operand.vmem [shape: bf16[16,64], index: 3, kind: output, shape index: {}]  }
   0x1   :  { %s16_s14 = sshll.u32 %s214_s1, 4  ;;  %s17_s14 = int_to_ptr.hbm [resolvable:$true] %s16_s14 }
   0x2   :  { %9 = vsyncpa [#allocation5], 0  ;;  %s174_s15 = smov [#allocation2]   ;;  %s30_s19 = sshll.u32 %s215_s2, 4  ;;  %s31_s19 = int_to_ptr.hbm [resolvable:$true] %s30_s19 }
   0x3   :  { %s18_s16 = sshll.u32 %s174_s15, 4  ;;  %s175_s20 = smov 64   ;;  %s19_s16 = int_to_ptr.vmem [resolvable:$true] %s18_s16 }
   0x4   :  { %s176_s21 = smov 4   ;;  %s177_s22 = smov [#allocation4]  }
   0x5   :  { %24 = dma.hbm_to_vmem [thread:$0]  %s17_s14, 256, %s19_s16, [#allocation3], %s175_s20, %s175_s20, %s176_s21  }
   0x6   :  { %s32_s23 = sshll.u32 %s177_s22, 4  ;;  %s33_s23 = int_to_ptr.vmem [resolvable:$true] %s32_s23 }
   0x7   :  { %35 = dma.hbm_to_vmem [thread:$0]  %s31_s19, 16, %s33_s23, [#allocation5]  }
   0x8   :  { %170 = dma.done.wait [#allocation3], 256  }
   0x9   :  { %171 = vsyncadd [#allocation3], 4294967040 }
   0xa   :  { %172 = dma.done.wait [#allocation5], 16  }
   0xb   :  { %173 = vsyncadd [#allocation5], 4294967280  ;;  %v116_v0 = vld [vmem:[#allocation2 + $0x8] sm:$0xff]  ;;  %v115_v1 = vld [vmem:[#allocation2] sm:$0xff]  ;;  %vm72_vm0 = vcmask 261120   ;;  %vm92_vm1 = vcmask 519168  }
   0xc   :  { %82 = vmatpush.bf16.msra.mxu0 %v116_v0  ;;  %v114_v2 = vld [vmem:[%s213_s0] sm:$0xff]  ;;  %v121_v3 = vld [vmem:[#allocation4] ss:$0 sm:$0xff] }
  0x10   :  { %83 = vmatpush.bf16.msra.mxu0 %v115_v1 }
  0x13   :  { %113 = vmatmul.msk.bf16.vlgmr.msra.gmra.mxu0 %vm72_vm0, %v114_v2 }
  0x90   :  { %v85_v4 = vpop.f32.mrf.mxu0 }
  0x91   :  { %v86_v5 = vadd.f32 %v121_v3, %v85_v4 }
  0x93   :  { %v90_v6 = vpack.c.bf16 %v86_v5, %v86_v5 }
  0x95   :  { %93 = vst.msk [vmem:[%s216_s3] sm:$0xf] %vm92_vm1, %v90_v6 }
  0x98   :  { %v87_v7 = vpop.f32.mrf.mxu0 }
  0x99   :  { %v88_v8 = vadd.f32 %v121_v3, %v87_v7 }
  0x9b   :  { %v91_v9 = vpack.c.bf16 %v88_v8, %v88_v8 }
  0x9d   :  { %94 = vst.msk [vmem:[%s216_s3 + $0x4] sm:$0xf] %vm92_vm1, %v91_v9 }
  0x9e   :  { %99 = vsyncpa [#allocation3], 1 }
  0x9f   :  { %100 = vsyncpa [#allocation5], 1 }

// kernel: decoder.16
= control target key start
LH: loop header
LB: loop body
LE: loop exit
PB: predicated region body
PF: predicated region fallthrough
CT: control target
= control target key end

     0   :  { %vm42_vm0 = vcmask 261120   ;;  %vm62_vm1 = vcmask 781312   ;;  %s124_s1 = inlined_call_operand.vmem [shape: bf16[32,96], index: 1, kind: input, shape index: {}]   ;;  %s125_s2 = inlined_call_operand.vmem [shape: f32[1,96], index: 2, kind: input, shape index: {}]   ;;  %s126_s0 = inlined_call_operand.vmem [shape: bf16[16,32], index: 0, kind: input, shape index: {}]   ;;  %s127_s3 = inlined_call_operand.vmem [shape: bf16[16,96], index: 3, kind: output, shape index: {}]  }
   0x1   :  { %v84_v0 = vld [vmem:[%s124_s1 + $0x8] sm:$0xff]  ;;  %v83_v1 = vld [vmem:[%s124_s1] sm:$0xff] }
   0x2   :  { %52 = vmatpush.bf16.msra.mxu0 %v84_v0  ;;  %v82_v2 = vld [vmem:[%s126_s0] sm:$0xff] }
   0x3   :  { %v85_v3 = vld [vmem:[%s125_s2] ss:$0 sm:$0xff] }
   0x6   :  { %53 = vmatpush.bf16.msra.mxu0 %v83_v1 }
   0x9   :  { %81 = vmatmul.msk.bf16.vlgmr.msra.gmra.mxu0 %vm42_vm0, %v82_v2 }
  0x86   :  { %v55_v4 = vpop.f32.mrf.mxu0 }
  0x87   :  { %v56_v5 = vadd.f32 %v85_v3, %v55_v4 }
  0x89   :  { %v60_v6 = vpack.c.bf16 %v56_v5, %v56_v5 }
  0x8b   :  { %63 = vst.msk [vmem:[%s127_s3] sm:$0xf] %vm62_vm1, %v60_v6 }
  0x8e   :  { %v57_v7 = vpop.f32.mrf.mxu0 }
  0x8f   :  { %v58_v8 = vadd.f32 %v85_v3, %v57_v7 }
  0x91   :  { %v61_v9 = vpack.c.bf16 %v58_v8, %v58_v8 }
  0x93   :  { %64 = vst.msk [vmem:[%s127_s3 + $0x4] sm:$0xf] %vm62_vm1, %v61_v9 }

// kernel: decoder.17
= control target key start
LH: loop header
LB: loop body
LE: loop exit
PB: predicated region body
PF: predicated region fallthrough
CT: control target
= control target key end

     0   :  { %s562_s6 = smov 0   ;;  %s607_s0 = inlined_call_operand.vmem [shape: bf16[2,8,96], index: 0, kind: input, shape index: {}]   ;;  %s608_s1 = inlined_call_operand.vmem [shape: bf16[2,32,8], index: 1, kind: output, shape index: {}]  }
   0x1 LB: > { %s478_s7 = sadd.s32 4294967295, %s539_s6   ;;  %p482_p0 = scmp.ge.s32.totalorder %s539_s6, 1  ;;  %s539_s6 = sphi %s562_s6, %s11_s6  }
   0x2   : > { %p86_p1 = scmp.lt.s32.totalorder %s539_s6, 3 }
   0x4   : > { %p87_p2 = pnand %p482_p0, %p86_p1 }
   0x5   : > { %p105_p3 = scmp.lt.s32.totalorder (!%p87_p2), %s478_s7, 1  ;;  %s541_s12 = smov (!%p87_p2), 96  }
   0x6   : > { %90 = sbr.rel (%p87_p2) target bundleno = 794 (0x31a), region = 24  ;;  %s542_s13 = smov (!%p87_p2), 88  }
   0x7   : > { %s543_s14 = smov (!%p87_p2), 104   ;;  %s544_s15 = smov (!%p87_p2), 120  }
   0x8   : > { %s545_s16 = smov (!%p87_p2), 72   ;;  %s546_s17 = smov (!%p87_p2), 80  }
   0x9   : > { %s547_s18 = smov (!%p87_p2), 112   ;;  %s548_s19 = smov (!%p87_p2), 64  }
   0xa   : > { %s549_s20 = smov (!%p87_p2), 40   ;;  %s550_s21 = smov (!%p87_p2), 48  }
   0xb   : > { %s610_s7 = smov (!%p105_p3, %s478_s7), 1  ;;  %vm121_vm0 = vcmask 64512   ;;  %s551_s22 = smov 56   ;;  %vm418_vm1 = vcmask 60416  }
   0xc   : > { %s483_s8 = sshll.u32 %s610_s7, 2  ;;  %s496_s23 = sshll.u32 %s610_s7, 4 }
   0xd   : > { %s108_s11 = scalar_lea.vmem %s607_s0, %s483_s8  ;;  %s113_s26 = scalar_lea.vmem %s608_s1, %s496_s23 }
   0xe   : > { %v115_v0 = vld [vmem:[%s108_s11] sm:$0xf] }
   0xf   : > { %v117_v1 = vunpack.c.l.b16 %v115_v0 }
  0x11   : > { %v118_v2 = vpack.c.b16 %v117_v1, %v117_v1 }
  0x13   : > { %119 = vrot.lane.b32.xlu1 %v118_v2, %s541_s12  ;;  %194 = vrot.lane.b32.xlu0 %v118_v2, %s542_s13 }
  0x14   : > { %340 = vrot.lane.b32.xlu2 %v118_v2, %s543_s14 }
  0x1b   : > { %192 = vrot.lane.b32.xlu0 %v118_v2, %s544_s15  ;;  %342 = vrot.lane.b32.xlu1 %v118_v2, %s545_s16 }
  0x1c   : > { %268 = vrot.lane.b32.xlu2 %v118_v2, %s546_s17 }
  0x23   : > { %266 = vrot.lane.b32.xlu0 %v118_v2, %s547_s18 }
  0x24   : > { %154 = vrot.lane.b32.xlu2 %v118_v2, %s548_s19 }
  0x6e   : > { %v341_v3 = vpop.permute.xlu2 %340 }
  0x76   : > { %v269_v4 = vpop.permute.xlu2 %268 }
  0x77   : > { %v274_v7 = vsel %vm121_vm0, %v269_v4, 0 }
  0x7e   : > { %v155_v30 = vpop.permute.xlu2 %154 }
  0x85   : > { %v120_v5 = vpop.permute.xlu1 %119  ;;  %v195_v6 = vpop.permute.xlu0 %194 }
  0x86   : > { %v126_v8 = vsel %vm121_vm0, %v120_v5, 0  ;;  %v200_v9 = vsel %vm121_vm0, %v195_v6, 0 }
  0x87   : > { %135 = vmatpush.bf16.xpose.msra.mxu0 %v126_v8  ;;  %209 = vmatpush.bf16.xpose.msra.mxu2 %v200_v9 }
  0x8d   : > { %v193_v10 = vpop.permute.xlu0 %192  ;;  %v343_v11 = vpop.permute.xlu1 %342 }
  0x8e   : > { %486 = vmatmul.msk.bf16.vlgmr.msra.gmra.mxu0 %vm121_vm0, %v115_v0  ;;  %488 = vmatmul.msk.bf16.vlgmr.msra.gmra.mxu2 %vm121_vm0, %v193_v10  ;;  %v348_v12 = vsel %vm121_vm0, %v343_v11, 0 }
  0x8f   : > { %283 = vmatpush.bf16.xpose.msrb.mxu0 %v274_v7  ;;  %357 = vmatpush.bf16.xpose.msrb.mxu2 %v348_v12 }
  0x95   : > { %v267_v13 = vpop.permute.xlu0 %266 }
  0x9e   : > { %490 = vmatmul.msk.bf16.vlgmr.msrb.gmra.mxu0 %vm121_vm0, %v267_v13  ;;  %492 = vmatmul.msk.bf16.vlgmr.msrb.gmra.mxu2 %vm121_vm0, %v341_v3 }
 0x10b   : > { %v137_v14 = vpop.f32.mrf.mxu0 }
 0x10c   : > { %v141_v15 = vmul.f32 0.35355338, %v137_v14 }
 0x10e   : > { %v142_v16 = vsel %vm121_vm0, %v141_v15, -inf }
 0x10f   : > { %143 = vmax.xlane.f32.xlu2 %v142_v16 }
 0x111   : > { %v211_v17 = vpop.f32.mrf.mxu2 }
 0x112   : > { %v215_v18 = vmul.f32 0.35355338, %v211_v17 }
 0x113   : > { %v139_v19 = vpop.f32.mrf.mxu0 }
 0x114   : > { %v216_v20 = vsel %vm121_vm0, %v215_v18, -inf }
 0x115   : > { %217 = vmax.xlane.f32.xlu1 %v216_v20 }
 0x119   : > { %v213_v21 = vpop.f32.mrf.mxu2 }
 0x11b   : > { %v285_v22 = vpop.f32.mrf.mxu0 }
 0x11c   : > { %v289_v23 = vmul.f32 0.35355338, %v285_v22 }
 0x11e   : > { %v290_v24 = vsel %vm121_vm0, %v289_v23, -inf }
 0x11f   : > { %291 = vmax.xlane.f32.xlu2 %v290_v24 }
 0x121   : > { %v359_v25 = vpop.f32.mrf.mxu2 }
 0x122   : > { %v363_v26 = vmul.f32 0.35355338, %v359_v25 }
 0x123   : > { %v287_v27 = vpop.f32.mrf.mxu0 }
 0x124   : > { %v364_v28 = vsel %vm121_vm0, %v363_v26, -inf }
 0x125   : > { %365 = vmax.xlane.f32.xlu0 %v364_v28 }
 0x129   : > { %v361_v29 = vpop.f32.mrf.mxu2 }
 0x12e   : > { %376 = vrot.lane.b32.xlu1 %v118_v2, %s549_s20 }
 0x137   : > { %302 = vrot.lane.b32.xlu2 %v118_v2, %s550_s21 }
 0x139   : > { %228 = vrot.lane.b32.xlu0 %v118_v2, %s551_s22 }
 0x182   : > { %v144_v31 = vpop.xlane.xlu2 %143 }
 0x183   : > { %v145_v32 = vsub.f32 %v141_v15, %v144_v31 }
 0x185   : > { %v146_v33 = vmul.f32 1.442695, %v145_v32 }
 0x187   : > { %517 = vpow2.f32 %v146_v33 }
 0x188   : > { %v218_v34 = vpop.xlane.xlu1 %217 }
 0x189   : > { %v219_v35 = vsub.f32 %v215_v18, %v218_v34 }
 0x18b   : > { %v220_v36 = vmul.f32 1.442695, %v219_v35 }
 0x18d   : > { %v518_v37 = vpop.eup %517  ;;  %519 = vpow2.f32 %v220_v36 }
 0x18e   : > { %v148_v38 = vsel %vm121_vm0, %v518_v37, 0.0 }
 0x18f   : > { %149 = vadd.xlane.f32.xlu1 %v148_v38 }
 0x192   : > { %v292_v39 = vpop.xlane.xlu2 %291 }
 0x193   : > { %v520_v40 = vpop.eup %519  ;;  %v293_v41 = vsub.f32 %v289_v23, %v292_v39 }
 0x194   : > { %v222_v43 = vsel %vm121_vm0, %v520_v40, 0.0 }
 0x195   : > { %v294_v42 = vmul.f32 1.442695, %v293_v41 }
 0x197   : > { %521 = vpow2.f32 %v294_v42  ;;  %223 = vadd.xlane.f32.xlu1 %v222_v43 }
 0x198   : > { %v366_v44 = vpop.xlane.xlu0 %365 }
 0x199   : > { %v367_v45 = vsub.f32 %v363_v26, %v366_v44 }
 0x19a   : > { %v303_v53 = vpop.permute.xlu2 %302 }
 0x19b   : > { %v368_v46 = vmul.f32 1.442695, %v367_v45 }
 0x19d   : > { %v522_v47 = vpop.eup %521  ;;  %523 = vpow2.f32 %v368_v46 }
 0x19e   : > { %v296_v48 = vsel %vm121_vm0, %v522_v47, 0.0 }
 0x19f   : > { %297 = vadd.xlane.f32.xlu2 %v296_v48 }
 0x1a0   : > { %v377_v51 = vpop.permute.xlu1 %376 }
 0x1a3   : > { %v524_v49 = vpop.eup %523 }
 0x1a4   : > { %v370_v50 = vsel %vm121_vm0, %v524_v49, 0.0 }
 0x1a5   : > { %371 = vadd.xlane.f32.xlu0 %v370_v50 }
 0x1ab   : > { %v229_v52 = vpop.permute.xlu0 %228 }
 0x1c8   : > { %379 = vxpose.xlu2.c.b16.start.end [1/1] (short) (narrow) %v377_v51, 16 }
 0x1ce   : > { %157 = vxpose.xlu0.c.b16.start.end [1/1] (short) (narrow) %v155_v30, 16 }
 0x1d1   : > { %231 = vxpose.xlu1.c.b16.start.end [1/1] (short) (narrow) %v229_v52, 16 }
 0x1e1   : > { %305 = vxpose.xlu1.c.b16.start.end [1/1] (short) (narrow) %v303_v53, 16 }
 0x202   : > { %v150_v54 = vpop.xlane.xlu1 %149 }
 0x203   : > { %525 = vrcp.f32 %v150_v54 }
 0x209   : > { %v526_v55 = vpop.eup %525 }
 0x20a   : > { %v224_v56 = vpop.xlane.xlu1 %223  ;;  %v152_v57 = vmul.f32 %v526_v55, %v518_v37 }
 0x20b   : > { %527 = vrcp.f32 %v224_v56 }
 0x20c   : > { %v153_v58 = vpack.c.bf16 %v152_v57, %v152_v57 }
 0x20e   : > { %v177_v59 = vsel %vm121_vm0, %v153_v58, 0 }
 0x20f   : > { %186 = vmatpush.bf16.xpose.msra.mxu1 %v177_v59 }
 0x211   : > { %v528_v60 = vpop.eup %527 }
 0x212   : > { %v298_v61 = vpop.xlane.xlu2 %297  ;;  %v226_v62 = vmul.f32 %v528_v60, %v520_v40 }
 0x213   : > { %529 = vrcp.f32 %v298_v61 }
 0x214   : > { %v227_v63 = vpack.c.bf16 %v226_v62, %v226_v62 }
 0x216   : > { %v251_v0 = vsel %vm121_vm0, %v227_v63, 0 }
 0x217   : > { %260 = vmatpush.bf16.xpose.msra.mxu3 %v251_v0 }
 0x218   : > { %v372_v1 = vpop.xlane.xlu0 %371 }
 0x219   : > { %v530_v2 = vpop.eup %529  ;;  %531 = vrcp.f32 %v372_v1 }
 0x21a   : > { %v300_v3 = vmul.f32 %v530_v2, %v522_v47 }
 0x21c   : > { %v301_v4 = vpack.c.bf16 %v300_v3, %v300_v3 }
 0x21e   : > { %v325_v5 = vsel %vm121_vm0, %v301_v4, 0 }
 0x21f   : > { %v532_v6 = vpop.eup %531  ;;  %334 = vmatpush.bf16.xpose.msrb.mxu1 %v325_v5 }
 0x220   : > { %v374_v7 = vmul.f32 %v532_v6, %v524_v49 }
 0x222   : > { %v375_v8 = vpack.c.bf16 %v374_v7, %v374_v7 }
 0x224   : > { %v399_v9 = vsel %vm121_vm0, %v375_v8, 0 }
 0x225   : > { %408 = vmatpush.bf16.xpose.msrb.mxu3 %v399_v9 }
 0x269   : > { %v387_v12 = vpop.trf.xlu2 }
 0x27a   : > { %v165_v10 = vpop.trf.xlu0 }
 0x27b   : > { %487 = vmatmul.msk.bf16.vlgmr.msra.gmra.mxu1 %vm121_vm0, %v165_v10 }
 0x27d   : > { %v239_v11 = vpop.trf.xlu1 }
 0x27e   : > { %489 = vmatmul.msk.bf16.vlgmr.msra.gmra.mxu3 %vm121_vm0, %v239_v11 }
 0x28d   : > { %v313_v13 = vpop.trf.xlu1 }
 0x28e   : > { %491 = vmatmul.msk.bf16.vlgmr.msrb.gmra.mxu1 %vm121_vm0, %v313_v13  ;;  %493 = vmatmul.msk.bf16.vlgmr.msrb.gmra.mxu3 %vm121_vm0, %v387_v12 }
 0x2f8   : > { %v188_v14 = vpop.f32.mrf.mxu1 }
 0x2f9   : > { %v414_v15 = vpack.c.bf16 %v188_v14, %v188_v14 }
 0x2fb   : > { %419 = vst.msk [vmem:[%s113_s26] sm:$0xf] %vm418_vm1, %v414_v15 }
 0x300   : > { %v190_v16 = vpop.f32.mrf.mxu1 }
 0x301   : > { %v262_v17 = vpop.f32.mrf.mxu3 }
 0x302   : > { %v415_v18 = vpack.c.bf16 %v262_v17, %v262_v17 }
 0x304   : > { %420 = vst.msk [vmem:[%s113_s26 + $0x4] sm:$0xf] %vm418_vm1, %v415_v18 }
 0x309   : > { %v264_v19 = vpop.f32.mrf.mxu3 }
 0x30b   : > { %v336_v20 = vpop.f32.mrf.mxu1 }
 0x30c   : > { %v416_v21 = vpack.c.bf16 %v336_v20, %v336_v20 }
 0x30e   : > { %421 = vst.msk [vmem:[%s113_s26 + $0x8] sm:$0xf] %vm418_vm1, %v416_v21 }
 0x311   : > { %v410_v22 = vpop.f32.mrf.mxu3 }
 0x312   : > { %v417_v23 = vpack.c.bf16 %v410_v22, %v410_v22 }
 0x313   : > { %v338_v24 = vpop.f32.mrf.mxu1 }
 0x314   : > { %422 = vst.msk [vmem:[%s113_s26 + $0xc] sm:$0xf] %vm418_vm1, %v417_v23 }
 0x319   : > { %v412_v25 = vpop.f32.mrf.mxu3 }
 0x31a PF: > { %s11_s6 = sadd.s32 1, %s539_s6  }
 0x31b   : > { %p8_p4 = scmp.ge.s32.totalorder %s11_s6, 4  }
 0x31d   :  { %10 = sbr.rel (!%p8_p4) target bundleno = 1 (0x1), region = 54 }

// kernel: decoder.19
= control target key start
LH: loop header
LB: loop body
LE: loop exit
PB: predicated region body
PF: predicated region fallthrough
CT: control target
= control target key end

     0   :  { %vm42_vm0 = vcmask 261120   ;;  %vm62_vm1 = vcmask 257024   ;;  %s124_s1 = inlined_call_operand.vmem [shape: bf16[32,32], index: 1, kind: input, shape index: {}]   ;;  %s125_s2 = inlined_call_operand.vmem [shape: f32[1,32], index: 2, kind: input, shape index: {}]   ;;  %s126_s0 = inlined_call_operand.vmem [shape: bf16[16,32], index: 0, kind: input, shape index: {}]   ;;  %s127_s3 = inlined_call_operand.vmem [shape: bf16[16,32], index: 3, kind: output, shape index: {}]  }
   0x1   :  { %v84_v0 = vld [vmem:[%s124_s1 + $0x8] sm:$0xff]  ;;  %v83_v1 = vld [vmem:[%s124_s1] sm:$0xff] }
   0x2   :  { %52 = vmatpush.bf16.msra.mxu0 %v84_v0  ;;  %v82_v2 = vld [vmem:[%s126_s0] sm:$0xff] }
   0x3   :  { %v85_v3 = vld [vmem:[%s125_s2] ss:$0 sm:$0xff] }
   0x6   :  { %53 = vmatpush.bf16.msra.mxu0 %v83_v1 }
   0x9   :  { %81 = vmatmul.msk.bf16.vlgmr.msra.gmra.mxu0 %vm42_vm0, %v82_v2 }
  0x86   :  { %v55_v4 = vpop.f32.mrf.mxu0 }
  0x87   :  { %v56_v5 = vadd.f32 %v85_v3, %v55_v4 }
  0x89   :  { %v60_v6 = vpack.c.bf16 %v56_v5, %v56_v5 }
  0x8b   :  { %63 = vst.msk [vmem:[%s127_s3] sm:$0xf] %vm62_vm1, %v60_v6 }
  0x8e   :  { %v57_v7 = vpop.f32.mrf.mxu0 }
  0x8f   :  { %v58_v8 = vadd.f32 %v85_v3, %v57_v7 }
  0x91   :  { %v61_v9 = vpack.c.bf16 %v58_v8, %v58_v8 }
  0x93   :  { %64 = vst.msk [vmem:[%s127_s3 + $0x4] sm:$0xf] %vm62_vm1, %v61_v9 }

// kernel: decoder.18
= control target key start
LH: loop header
LB: loop body
LE: loop exit
PB: predicated region body
PF: predicated region fallthrough
CT: control target
= control target key end

     0   :  { %s438_s15 = smov 0   ;;  %s475_s0 = inlined_call_operand.vmem [shape: bf16[2,8,32], index: 0, kind: input, shape index: {}]   ;;  %s476_s1 = inlined_call_operand.vmem [shape: bf16[32,32], index: 1, kind: input, shape index: {}]   ;;  %s477_s2 = inlined_call_operand.vmem [shape: f32[1,32], index: 2, kind: input, shape index: {}]   ;;  %s478_s3 = inlined_call_operand.vmem [shape: bf16[2,8,32], index: 3, kind: input, shape index: {}]   ;;  %s479_s4 = inlined_call_operand.vmem [shape: bf16[2,8,32], index: 4, kind: output, shape index: {}]  }
   0x1 LB: > { %s365_s16 = sadd.s32 4294967295, %s410_s15   ;;  %p369_p0 = scmp.ge.s32.totalorder %s410_s15, 1  ;;  %s410_s15 = sphi %s438_s15, %s14_s15  }
   0x2   : > { %p170_p1 = scmp.lt.s32.totalorder %s410_s15, 3 }
   0x4   : > { %p171_p2 = pnand %p369_p0, %p170_p1 }
   0x5   : > { %p198_p3 = scmp.lt.s32.totalorder (!%p171_p2), %s365_s16, 1 }
   0x6   : > { %174 = sbr.rel (%p171_p2) target bundleno = 542 (0x21e), region = 36 }
   0xb   : > { %v385_v0 = vld [vmem:[%s476_s1 + $0x8] sm:$0xff]  ;;  %v384_v1 = vld [vmem:[%s476_s1] sm:$0xff]  ;;  %s481_s16 = smov (!%p198_p3, %s365_s16), 1  ;;  %vm232_vm0 = vcmask 261120   ;;  %v412_v18 = vmov 256.0   ;;  %vm298_vm5 = vcmask 257024  }
   0xc   : > { %242 = vmatpush.bf16.msra.mxu0 %v385_v0  ;;  %s452_s21 = sshll.u32 %s481_s16, 2  ;;  %v399_v4 = vld [vmem:[%s477_s2] ss:$0 sm:$0xff]  ;;  %400 = vrcp.f32 %v412_v18 }
   0xd   : > { %s201_s24 = scalar_lea.vmem %s475_s0, %s452_s21  ;;  %s205_s27 = scalar_lea.vmem %s478_s3, %s452_s21 }
   0xe   : > { %v211_v2 = vld [vmem:[%s201_s24] sm:$0xf]  ;;  %s209_s8 = scalar_lea.vmem %s479_s4, %s452_s21 }
   0xf   : > { %v249_v3 = vld [vmem:[%s205_s27] sm:$0xf] }
  0x10   : > { %243 = vmatpush.bf16.msra.mxu0 %v384_v1  ;;  %v250_v5 = vunpack.c.l.bf16 %v249_v3 }
  0x12   : > { %v401_v19 = vpop.eup %400 }
  0x13   : > { %381 = vmatmul.msk.bf16.vlgmr.msra.gmra.mxu0 %vm232_vm0, %v211_v2  ;;  %v264_v20 = vmul.f32 256.0, %v401_v19  ;;  %vm268_vm1 = vweird.f32 %v401_v19 }
  0x15   : > { %v265_v21 = vsub.f32 1.0, %v264_v20 }
  0x17   : > { %v266_v22 = vmul.f32 %v401_v19, %v265_v21 }
  0x19   : > { %v267_v23 = vadd.f32 %v401_v19, %v266_v22 }
  0x1b   : > { %v269_v24 = vsel %vm268_vm1, %v401_v19, %v267_v23 }
  0x90   : > { %v245_v6 = vpop.f32.mrf.mxu0 }
  0x91   : > { %v246_v7 = vadd.f32 %v399_v4, %v245_v6 }
  0x93   : > { %v251_v8 = vadd.f32 %v250_v5, %v246_v7 }
  0x95   : > { %v252_v9 = vsel %vm232_vm0, %v251_v8, 0.0 }
  0x96   : > { %253 = vadd.xlane.f32.xlu0 %v252_v9 }
  0x98   : > { %v247_v10 = vpop.f32.mrf.mxu0 }
 0x109   : > { %v254_v11 = vpop.xlane.xlu0 %253 }
 0x10a   : > { %v255_v12 = vrot.slane %v254_v11, 4 }
 0x10c   : > { %v256_v13 = vadd.f32 %v255_v12, %v254_v11 }
 0x10e   : > { %v257_v14 = vrot.slane %v256_v13, 2 }
 0x110   : > { %v258_v15 = vadd.f32 %v257_v14, %v256_v13 }
 0x112   : > { %v259_v16 = vrot.slane %v258_v15, 1 }
 0x114   : > { %v260_v17 = vadd.f32 %v259_v16, %v258_v15 }
 0x116   : > { %386 = vpush %v260_v17 }
 0x147   : > { %s387_s30 = spop %386 }
 0x148   : > { %v262_v25 = vstv %s387_s30 }
 0x149   : > { %v270_v26 = vmul.f32 %v269_v24, %v262_v25 }
 0x14b   : > { %v271_v27 = vsub.f32 %v251_v8, %v270_v26 }
 0x14d   : > { %v272_v28 = vmul.f32 %v271_v27, %v271_v27 }
 0x14f   : > { %v273_v29 = vsel %vm232_vm0, %v272_v28, 0.0 }
 0x150   : > { %274 = vadd.xlane.f32.xlu0 %v273_v29 }
 0x1c3   : > { %v275_v30 = vpop.xlane.xlu0 %274 }
 0x1c4   : > { %v276_v31 = vrot.slane %v275_v30, 4 }
 0x1c6   : > { %v277_v32 = vadd.f32 %v276_v31, %v275_v30 }
 0x1c8   : > { %v278_v33 = vrot.slane %v277_v32, 2 }
 0x1ca   : > { %v279_v34 = vadd.f32 %v278_v33, %v277_v32 }
 0x1cc   : > { %v280_v35 = vrot.slane %v279_v34, 1 }
 0x1ce   : > { %v281_v36 = vadd.f32 %v280_v35, %v279_v34 }
 0x1d0   : > { %388 = vpush %v281_v36 }
 0x201   : > { %s389_s5 = spop %388 }
 0x202   : > { %v283_v37 = vstv %s389_s5 }
 0x203   : > { %v284_v38 = vmul.f32 %v283_v37, %v269_v24 }
 0x205   : > { %v285_v39 = vadd.f32 1e-05, %v284_v38 }
 0x207   : > { %402 = vrsqrt.f32 %v285_v39  ;;  %vm292_vm3 = vweird.f32 %v285_v39 }
 0x20d   : > { %v403_v40 = vpop.eup %402 }
 0x20e   : > { %v287_v41 = vmul.f32 %v403_v40, %v285_v39  ;;  %vm293_vm2 = vweird.f32 %v403_v40 }
 0x20f   : > { %vm294_vm4 = vmor %vm292_vm3, %vm293_vm2 }
 0x210   : > { %v288_v42 = vmul.f32 %v403_v40, %v287_v41 }
 0x212   : > { %v289_v43 = vmul.f32 0.5, %v288_v42 }
 0x214   : > { %v290_v44 = vsub.f32 1.5, %v289_v43 }
 0x216   : > { %v291_v45 = vmul.f32 %v403_v40, %v290_v44 }
 0x218   : > { %v295_v46 = vsel %vm294_vm4, %v403_v40, %v291_v45 }
 0x219   : > { %v296_v47 = vmul.f32 %v295_v46, %v271_v27 }
 0x21b   : > { %v297_v48 = vpack.c.bf16 %v296_v47, %v296_v47 }
 0x21d   : > { %299 = vst.msk [vmem:[%s209_s8] sm:$0xf] %vm298_vm5, %v297_v48 }
 0x21e PF: > { %s14_s15 = sadd.s32 1, %s410_s15  }
 0x21f   : > { %p11_p4 = scmp.ge.s32.totalorder %s14_s15, 4  }
 0x221   :  { %13 = sbr.rel (!%p11_p4) target bundleno = 1 (0x1), region = 69 }

// kernel: decoder.21
= control target key start
LH: loop header
LB: loop body
LE: loop exit
PB: predicated region body
PF: predicated region fallthrough
CT: control target
= control target key end

     0   :  { %s618_s9 = smov 0   ;;  %s666_s0 = inlined_call_operand.vmem [shape: bf16[2,8,32], index: 0, kind: input, shape index: {}]   ;;  %s667_s1 = inlined_call_operand.vmem [shape: bf16[2,8,64], index: 1, kind: input, shape index: {}]   ;;  %s668_s2 = inlined_call_operand.vmem [shape: bf16[2,32,8], index: 2, kind: output, shape index: {}]  }
   0x1 LB: > { %s536_s10 = sadd.s32 4294967295, %s594_s9   ;;  %p540_p0 = scmp.ge.s32.totalorder %s594_s9, 1  ;;  %s594_s9 = sphi %s618_s9, %s12_s9  }
   0x2   : > { %p120_p1 = scmp.lt.s32.totalorder %s594_s9, 3 }
   0x4   : > { %p121_p2 = pnand %p540_p0, %p120_p1 }
   0x5   : > { %p145_p3 = scmp.lt.s32.totalorder (!%p121_p2), %s536_s10, 1  ;;  %s596_s18 = smov (!%p121_p2), 112  }
   0x6   : > { %124 = sbr.rel (%p121_p2) target bundleno = 804 (0x324), region = 28  ;;  %s597_s19 = smov (!%p121_p2), 120  }
   0x7   : > { %s598_s20 = smov (!%p121_p2), 104   ;;  %s599_s21 = smov (!%p121_p2), 72  }
   0x8   : > { %s600_s22 = smov (!%p121_p2), 96   ;;  %s601_s23 = smov (!%p121_p2), 88  }
   0x9   : > { %s602_s24 = smov (!%p121_p2), 80  }
   0xb   : > { %s670_s10 = smov (!%p145_p3, %s536_s10), 1  ;;  %vm161_vm0 = vcmask 64512   ;;  %vm464_vm1 = vcmask 60416  }
   0xc   : > { %s541_s11 = sshll.u32 %s670_s10, 2  ;;  %s555_s25 = sshll.u32 %s670_s10, 4 }
   0xd   : > { %s152_s14 = scalar_lea.vmem %s667_s1, %s541_s11  ;;  %s148_s17 = scalar_lea.vmem %s666_s0, %s541_s11 }
   0xe   : > { %v159_v0 = vld [vmem:[%s152_s14] sm:$0xf]  ;;  %s157_s28 = scalar_lea.vmem %s668_s2, %s555_s25 }
   0xf   : > { %v166_v1 = vsel %vm161_vm0, %v159_v0, 0  ;;  %v195_v2 = vunpack.c.l.b16 %v159_v0  ;;  %v160_v3 = vld [vmem:[%s148_s17] sm:$0xf] }
  0x10   : > { %175 = vmatpush.bf16.xpose.msra.mxu0 %v166_v1  ;;  %v236_v5 = vunpack.c.l.b16 %v160_v3 }
  0x11   : > { %v196_v4 = vpack.c.b16 %v195_v2, %v195_v2 }
  0x12   : > { %v237_v6 = vpack.c.b16 %v236_v5, %v236_v5 }
  0x13   : > { %314 = vrot.lane.b32.xlu2 %v196_v4, %s596_s18  ;;  %240 = vrot.lane.b32.xlu0 %v196_v4, %s597_s19 }
  0x14   : > { %388 = vrot.lane.b32.xlu1 %v196_v4, %s598_s20 }
  0x17   : > { %545 = vmatmul.msk.bf16.vlgmr.msra.gmra.mxu0 %vm161_vm0, %v160_v3 }
  0x1b   : > { %312 = vrot.lane.b32.xlu2 %v237_v6, %s596_s18  ;;  %238 = vrot.lane.b32.xlu0 %v237_v6, %s597_s19 }
  0x1c   : > { %386 = vrot.lane.b32.xlu1 %v237_v6, %s598_s20 }
  0x6d   : > { %v315_v7 = vpop.permute.xlu2 %314 }
  0x6e   : > { %v320_v8 = vsel %vm161_vm0, %v315_v7, 0 }
  0x6f   : > { %329 = vmatpush.bf16.xpose.msrb.mxu0 %v320_v8 }
  0x75   : > { %v313_v9 = vpop.permute.xlu2 %312 }
  0x76   : > { %549 = vmatmul.msk.bf16.vlgmr.msrb.gmra.mxu0 %vm161_vm0, %v313_v9 }
  0x85   : > { %v241_v10 = vpop.permute.xlu0 %240 }
  0x86   : > { %v246_v11 = vsel %vm161_vm0, %v241_v10, 0  ;;  %v389_v12 = vpop.permute.xlu1 %388 }
  0x87   : > { %255 = vmatpush.bf16.xpose.msra.mxu2 %v246_v11  ;;  %v394_v13 = vsel %vm161_vm0, %v389_v12, 0 }
  0x8d   : > { %v239_v14 = vpop.permute.xlu0 %238 }
  0x8e   : > { %547 = vmatmul.msk.bf16.vlgmr.msra.gmra.mxu2 %vm161_vm0, %v239_v14  ;;  %v387_v18 = vpop.permute.xlu1 %386 }
  0x8f   : > { %403 = vmatpush.bf16.xpose.msrb.mxu2 %v394_v13 }
  0x94   : > { %v177_v15 = vpop.f32.mrf.mxu0 }
  0x95   : > { %v181_v16 = vmul.f32 0.35355338, %v177_v15 }
  0x97   : > { %v182_v17 = vsel %vm161_vm0, %v181_v16, -inf }
  0x98   : > { %183 = vmax.xlane.f32.xlu1 %v182_v17 }
  0x9c   : > { %v179_v19 = vpop.f32.mrf.mxu0 }
  0x9e   : > { %551 = vmatmul.msk.bf16.vlgmr.msrb.gmra.mxu2 %vm161_vm0, %v387_v18 }
  0xb1   : > { %422 = vrot.lane.b32.xlu1 %v196_v4, %s599_s21 }
  0xf3   : > { %v331_v20 = vpop.f32.mrf.mxu0 }
  0xf4   : > { %v335_v21 = vmul.f32 0.35355338, %v331_v20 }
  0xf6   : > { %v336_v22 = vsel %vm161_vm0, %v335_v21, -inf }
  0xf7   : > { %337 = vmax.xlane.f32.xlu2 %v336_v22 }
  0xfb   : > { %v333_v23 = vpop.f32.mrf.mxu0 }
 0x10b   : > { %v184_v24 = vpop.xlane.xlu1 %183 }
 0x10c   : > { %v185_v25 = vsub.f32 %v181_v16, %v184_v24 }
 0x10e   : > { %v186_v26 = vmul.f32 1.442695, %v185_v25 }
 0x10f   : > { %197 = vrot.lane.b32.xlu2 %v196_v4, %s600_s22 }
 0x110   : > { %572 = vpow2.f32 %v186_v26 }
 0x111   : > { %v257_v27 = vpop.f32.mrf.mxu2 }
 0x112   : > { %v261_v28 = vmul.f32 0.35355338, %v257_v27 }
 0x114   : > { %v262_v29 = vsel %vm161_vm0, %v261_v28, -inf }
 0x115   : > { %263 = vmax.xlane.f32.xlu0 %v262_v29 }
 0x116   : > { %v573_v30 = vpop.eup %572 }
 0x117   : > { %v188_v31 = vsel %vm161_vm0, %v573_v30, 0.0 }
 0x118   : > { %189 = vadd.xlane.f32.xlu1 %v188_v31 }
 0x119   : > { %v259_v32 = vpop.f32.mrf.mxu2 }
 0x121   : > { %v405_v33 = vpop.f32.mrf.mxu2 }
 0x122   : > { %v409_v35 = vmul.f32 0.35355338, %v405_v33 }
 0x123   : > { %v423_v42 = vpop.permute.xlu1 %422 }
 0x124   : > { %v410_v36 = vsel %vm161_vm0, %v409_v35, -inf }
 0x129   : > { %v407_v34 = vpop.f32.mrf.mxu2  ;;  %274 = vrot.lane.b32.xlu0 %v196_v4, %s601_s23 }
 0x138   : > { %411 = vmax.xlane.f32.xlu2 %v410_v36 }
 0x150   : > { %348 = vrot.lane.b32.xlu2 %v196_v4, %s602_s24 }
 0x16a   : > { %v338_v37 = vpop.xlane.xlu2 %337 }
 0x16b   : > { %v339_v38 = vsub.f32 %v335_v21, %v338_v37 }
 0x16d   : > { %v340_v39 = vmul.f32 1.442695, %v339_v38 }
 0x16f   : > { %574 = vpow2.f32 %v340_v39 }
 0x172   : > { %v198_v53 = vpop.permute.xlu2 %197 }
 0x175   : > { %v575_v40 = vpop.eup %574 }
 0x176   : > { %v342_v41 = vsel %vm161_vm0, %v575_v40, 0.0 }
 0x179   : > { %343 = vadd.xlane.f32.xlu2 %v342_v41 }
 0x188   : > { %v264_v43 = vpop.xlane.xlu0 %263 }
 0x189   : > { %v265_v44 = vsub.f32 %v261_v28, %v264_v43 }
 0x18b   : > { %v266_v45 = vmul.f32 1.442695, %v265_v44  ;;  %v190_v46 = vpop.xlane.xlu1 %189 }
 0x18c   : > { %576 = vrcp.f32 %v190_v46 }
 0x18d   : > { %578 = vpow2.f32 %v266_v45 }
 0x192   : > { %v577_v47 = vpop.eup %576 }
 0x193   : > { %v579_v48 = vpop.eup %578  ;;  %v192_v49 = vmul.f32 %v577_v47, %v573_v30 }
 0x194   : > { %v268_v50 = vsel %vm161_vm0, %v579_v48, 0.0 }
 0x195   : > { %269 = vadd.xlane.f32.xlu1 %v268_v50  ;;  %v193_v51 = vpack.c.bf16 %v192_v49, %v192_v49 }
 0x197   : > { %v220_v52 = vsel %vm161_vm0, %v193_v51, 0 }
 0x198   : > { %229 = vmatpush.bf16.xpose.msra.mxu1 %v220_v52 }
 0x19b   : > { %v275_v59 = vpop.permute.xlu0 %274 }
 0x1a2   : > { %425 = vxpose.xlu2.c.b16.start.end [1/1] (short) (narrow) %v423_v42, 16 }
 0x1ab   : > { %v412_v54 = vpop.xlane.xlu2 %411 }
 0x1ac   : > { %v413_v55 = vsub.f32 %v409_v35, %v412_v54 }
 0x1ae   : > { %v414_v56 = vmul.f32 1.442695, %v413_v55 }
 0x1b0   : > { %580 = vpow2.f32 %v414_v56 }
 0x1b3   : > { %v349_v60 = vpop.permute.xlu2 %348 }
 0x1b6   : > { %v581_v57 = vpop.eup %580 }
 0x1b7   : > { %v416_v58 = vsel %vm161_vm0, %v581_v57, 0.0 }
 0x1b8   : > { %417 = vadd.xlane.f32.xlu0 %v416_v58 }
 0x1cf   : > { %277 = vxpose.xlu1.c.b16.start.end [1/1] (short) (narrow) %v275_v59, 16 }
 0x1df   : > { %351 = vxpose.xlu1.c.b16.start.end [1/1] (short) (narrow) %v349_v60, 16 }
 0x1e1   : > { %200 = vxpose.xlu0.c.b16.start.end [1/1] (short) (narrow) %v198_v53, 16 }
 0x1ec   : > { %v344_v61 = vpop.xlane.xlu2 %343 }
 0x1ed   : > { %582 = vrcp.f32 %v344_v61 }
 0x1f3   : > { %v583_v62 = vpop.eup %582 }
 0x1f4   : > { %v346_v63 = vmul.f32 %v583_v62, %v575_v40 }
 0x1f6   : > { %v347_v0 = vpack.c.bf16 %v346_v63, %v346_v63 }
 0x1f8   : > { %v371_v1 = vsel %vm161_vm0, %v347_v0, 0 }
 0x1f9   : > { %380 = vmatpush.bf16.xpose.msrb.mxu1 %v371_v1 }
 0x208   : > { %v270_v2 = vpop.xlane.xlu1 %269 }
 0x209   : > { %584 = vrcp.f32 %v270_v2 }
 0x20f   : > { %v585_v3 = vpop.eup %584 }
 0x210   : > { %v272_v4 = vmul.f32 %v585_v3, %v579_v48 }
 0x212   : > { %v273_v5 = vpack.c.bf16 %v272_v4, %v272_v4 }
 0x214   : > { %v297_v6 = vsel %vm161_vm0, %v273_v5, 0 }
 0x215   : > { %306 = vmatpush.bf16.xpose.msra.mxu3 %v297_v6 }
 0x22b   : > { %v418_v7 = vpop.xlane.xlu0 %417 }
 0x22c   : > { %586 = vrcp.f32 %v418_v7 }
 0x232   : > { %v587_v8 = vpop.eup %586 }
 0x233   : > { %v420_v9 = vmul.f32 %v587_v8, %v581_v57 }
 0x235   : > { %v421_v10 = vpack.c.bf16 %v420_v9, %v420_v9 }
 0x237   : > { %v445_v11 = vsel %vm161_vm0, %v421_v10, 0 }
 0x238   : > { %454 = vmatpush.bf16.xpose.msrb.mxu3 %v445_v11 }
 0x243   : > { %v433_v13 = vpop.trf.xlu2 }
 0x27b   : > { %v285_v12 = vpop.trf.xlu1 }
 0x27c   : > { %548 = vmatmul.msk.bf16.vlgmr.msra.gmra.mxu3 %vm161_vm0, %v285_v12 }
 0x28b   : > { %v359_v15 = vpop.trf.xlu1 }
 0x28c   : > { %552 = vmatmul.msk.bf16.vlgmr.msrb.gmra.mxu3 %vm161_vm0, %v433_v13 }
 0x28d   : > { %v208_v14 = vpop.trf.xlu0 }
 0x28e   : > { %546 = vmatmul.msk.bf16.vlgmr.msra.gmra.mxu1 %vm161_vm0, %v208_v14 }
 0x29e   : > { %550 = vmatmul.msk.bf16.vlgmr.msrb.gmra.mxu1 %vm161_vm0, %v359_v15 }
 0x2ff   : > { %v308_v16 = vpop.f32.mrf.mxu3 }
 0x300   : > { %v461_v17 = vpack.c.bf16 %v308_v16, %v308_v16 }
 0x302   : > { %466 = vst.msk [vmem:[%s157_s28 + $0x4] sm:$0xf] %vm464_vm1, %v461_v17 }
 0x307   : > { %v310_v18 = vpop.f32.mrf.mxu3 }
 0x30b   : > { %v231_v19 = vpop.f32.mrf.mxu1 }
 0x30c   : > { %v460_v20 = vpack.c.bf16 %v231_v19, %v231_v19 }
 0x30e   : > { %465 = vst.msk [vmem:[%s157_s28] sm:$0xf] %vm464_vm1, %v460_v20 }
 0x30f   : > { %v456_v21 = vpop.f32.mrf.mxu3 }
 0x310   : > { %v463_v22 = vpack.c.bf16 %v456_v21, %v456_v21 }
 0x312   : > { %468 = vst.msk [vmem:[%s157_s28 + $0xc] sm:$0xf] %vm464_vm1, %v463_v22 }
 0x313   : > { %v233_v23 = vpop.f32.mrf.mxu1 }
 0x317   : > { %v458_v24 = vpop.f32.mrf.mxu3 }
 0x31b   : > { %v382_v25 = vpop.f32.mrf.mxu1 }
 0x31c   : > { %v462_v26 = vpack.c.bf16 %v382_v25, %v382_v25 }
 0x31e   : > { %467 = vst.msk [vmem:[%s157_s28 + $0x8] sm:$0xf] %vm464_vm1, %v462_v26 }
 0x323   : > { %v384_v27 = vpop.f32.mrf.mxu1 }
 0x324 PF: > { %s12_s9 = sadd.s32 1, %s594_s9  }
 0x325   : > { %p9_p4 = scmp.ge.s32.totalorder %s12_s9, 4  }
 0x327   :  { %11 = sbr.rel (!%p9_p4) target bundleno = 1 (0x1), region = 61 }

// kernel: decoder.23
= control target key start
LH: loop header
LB: loop body
LE: loop exit
PB: predicated region body
PF: predicated region fallthrough
CT: control target
= control target key end

     0   :  { %s684_s18 = smov 0   ;;  %s686_s19 = smov 0   ;;  %s753_s0 = inlined_call_operand.vmem [shape: bf16[2,8,32], index: 0, kind: input, shape index: {}]   ;;  %s754_s1 = inlined_call_operand.vmem [shape: bf16[32,64], index: 1, kind: input, shape index: {}]   ;;  %s755_s2 = inlined_call_operand.vmem [shape: f32[1,64], index: 2, kind: input, shape index: {}]   ;;  %s756_s3 = inlined_call_operand.vmem [shape: bf16[64,32], index: 3, kind: input, shape index: {}]   ;;  %s757_s4 = inlined_call_operand.vmem [shape: f32[1,32], index: 4, kind: input, shape index: {}]   ;;  %s758_s5 = inlined_call_operand.vmem [shape: bf16[2,8,32], index: 5, kind: output, shape index: {}]  }
   0x1   :  { %s688_s20 = smov 0  }
   0x2 LB: > { %s27_s21 = sadd.s32 1, %s646_s19  ;;  %p555_p0 = scmp.ge.s32.totalorder %s650_s20, 1  ;;  %s650_s20 = sphi %s688_s20, %s15_s20   ;;  %s646_s19 = sphi %s686_s19, %s760_s19   ;;  %s642_s18 = sphi %s684_s18, %s759_s18  }
   0x3   : > { %p29_p1 = scmp.ge.s32.totalorder %s27_s21, 2  ;;  %p226_p2 = scmp.lt.s32.totalorder %s650_s20, 3 }
   0x5   : > { %s762_s21 = smov (%p29_p1, %s27_s21), 0  ;;  %p227_p3 = pnand %p555_p0, %p226_p2 }
   0x6   : > { %p264_p4 = scmp.lt.s32.totalorder (!%p227_p3), %s642_s18, 1 }
   0x7   : > { %230 = sbr.rel (%p227_p3) target bundleno = 685 (0x2ad), region = 40 }
   0xc   : > { %v587_v0 = vld [vmem:[%s754_s1 + $0x8] sm:$0xff]  ;;  %v591_v1 = vld [vmem:[%s756_s3 + $0x18] sm:$0xff]  ;;  %v586_v2 = vld [vmem:[%s754_s1] sm:$0xff]  ;;  %s764_s18 = smov (!%p264_p4, %s642_s18), 1  ;;  %vm290_vm0 = vcmask 261120   ;;  %v652_v7 = vmov 0.0  }
   0xd   : > { %323 = vmatpush.bf16.msra.mxu0 %v587_v0  ;;  %373 = vmatpush.bf16.msra.mxu1 %v591_v1  ;;  %v590_v3 = vld [vmem:[%s756_s3 + $0x10] sm:$0xff]  ;;  %s556_s30 = sshll.u32 %s764_s18, 2  ;;  %v589_v5 = vld [vmem:[%s756_s3 + $0x8] sm:$0xff]  ;;  %v588_v6 = vld [vmem:[%s756_s3] sm:$0xff]  ;;  %291 = vst.msk [vmem:[#allocation2] sm:$0xff] %vm290_vm0, %v652_v7  ;;  %vm365_vm1 = vcmask 523264  }
   0xe   : > { %s267_s8 = scalar_lea.vmem %s753_s0, %s556_s30  ;;  %v622_v8 = vld [vmem:[%s755_s2] ss:$0 sm:$0xff]  ;;  %v653_v32 = vmov 256.0   ;;  %s284_s25 = scalar_lea.vmem %s758_s5, %s556_s30  ;;  %vm442_vm6 = vcmask 257024  }
   0xf   : > { %v292_v4 = vld [vmem:[%s267_s8] sm:$0xf]  ;;  %624 = vrcp.f32 %v653_v32 }
  0x10   : > { %v393_v17 = vld [vmem:[%s267_s8] sm:$0xf] }
  0x11   : > { %324 = vmatpush.bf16.msra.mxu0 %v586_v2  ;;  %374 = vmatpush.bf16.msra.mxu1 %v590_v3  ;;  %v623_v18 = vld [vmem:[%s757_s4] ss:$0 sm:$0xff]  ;;  %v394_v20 = vunpack.c.l.bf16 %v393_v17 }
  0x14   : > { %566 = vmatmul.msk.bf16.vlgmr.msra.gmra.mxu0 %vm290_vm0, %v292_v4  ;;  %v331_v14 = vld [vmem:[#allocation2] sm:$0xff] }
  0x15   : > { %375 = vmatpush.bf16.msra.mxu1 %v589_v5  ;;  %v625_v33 = vpop.eup %624 }
  0x16   : > { %v408_v34 = vmul.f32 256.0, %v625_v33  ;;  %vm412_vm2 = vweird.f32 %v625_v33 }
  0x18   : > { %v409_v35 = vsub.f32 1.0, %v408_v34 }
  0x19   : > { %376 = vmatpush.bf16.msra.mxu1 %v588_v6 }
  0x1a   : > { %v410_v36 = vmul.f32 %v625_v33, %v409_v35 }
  0x1c   : > { %v411_v37 = vadd.f32 %v625_v33, %v410_v36 }
  0x1e   : > { %v413_v38 = vsel %vm412_vm2, %v625_v33, %v411_v37 }
  0x91   : > { %v326_v9 = vpop.f32.mrf.mxu0 }
  0x92   : > { %v327_v10 = vadd.f32 %v622_v8, %v326_v9 }
  0x94   : > { %v330_v11 = vmax.f32 %v327_v10, 0.0 }
  0x96   : > { %v332_v12 = vpack.c.bf16 %v330_v11, %v330_v11 }
  0x98   : > { %583 = vmatmul.msk.bf16.vlgmr.msra.gmra.mxu1 %vm365_vm1, %v332_v12 }
  0x99   : > { %v328_v13 = vpop.f32.mrf.mxu0 }
 0x115   : > { %v378_v15 = vpop.f32.mrf.mxu1 }
 0x116   : > { %v382_v16 = vadd.f32 %v378_v15, %v331_v14 }
 0x118   : > { %383 = vst.msk [vmem:[#allocation2] sm:$0xff] %vm290_vm0, %v382_v16 }
 0x11d   : > { %v380_v19 = vpop.f32.mrf.mxu1 }
 0x11f   : > { %v387_v21 = vld [vmem:[#allocation2] sm:$0xff] }
 0x120   : > { %v392_v22 = vadd.f32 %v623_v18, %v387_v21 }
 0x122   : > { %v395_v23 = vadd.f32 %v394_v20, %v392_v22 }
 0x124   : > { %v396_v24 = vsel %vm290_vm0, %v395_v23, 0.0 }
 0x125   : > { %397 = vadd.xlane.f32.xlu0 %v396_v24 }
 0x198   : > { %v398_v25 = vpop.xlane.xlu0 %397 }
 0x199   : > { %v399_v26 = vrot.slane %v398_v25, 4 }
 0x19b   : > { %v400_v27 = vadd.f32 %v399_v26, %v398_v25 }
 0x19d   : > { %v401_v28 = vrot.slane %v400_v27, 2 }
 0x19f   : > { %v402_v29 = vadd.f32 %v401_v28, %v400_v27 }
 0x1a1   : > { %v403_v30 = vrot.slane %v402_v29, 1 }
 0x1a3   : > { %v404_v31 = vadd.f32 %v403_v30, %v402_v29 }
 0x1a5   : > { %592 = vpush %v404_v31 }
 0x1d6   : > { %s593_s17 = spop %592 }
 0x1d7   : > { %v406_v39 = vstv %s593_s17 }
 0x1d8   : > { %v414_v40 = vmul.f32 %v413_v38, %v406_v39 }
 0x1da   : > { %v415_v41 = vsub.f32 %v395_v23, %v414_v40 }
 0x1dc   : > { %v416_v42 = vmul.f32 %v415_v41, %v415_v41 }
 0x1de   : > { %v417_v43 = vsel %vm290_vm0, %v416_v42, 0.0 }
 0x1df   : > { %418 = vadd.xlane.f32.xlu0 %v417_v43 }
 0x252   : > { %v419_v44 = vpop.xlane.xlu0 %418 }
 0x253   : > { %v420_v45 = vrot.slane %v419_v44, 4 }
 0x255   : > { %v421_v46 = vadd.f32 %v420_v45, %v419_v44 }
 0x257   : > { %v422_v47 = vrot.slane %v421_v46, 2 }
 0x259   : > { %v423_v48 = vadd.f32 %v422_v47, %v421_v46 }
 0x25b   : > { %v424_v49 = vrot.slane %v423_v48, 1 }
 0x25d   : > { %v425_v50 = vadd.f32 %v424_v49, %v423_v48 }
 0x25f   : > { %594 = vpush %v425_v50 }
 0x290   : > { %s595_s22 = spop %594 }
 0x291   : > { %v427_v51 = vstv %s595_s22 }
 0x292   : > { %v428_v52 = vmul.f32 %v427_v51, %v413_v38 }
 0x294   : > { %v429_v53 = vadd.f32 1e-05, %v428_v52 }
 0x296   : > { %626 = vrsqrt.f32 %v429_v53  ;;  %vm436_vm4 = vweird.f32 %v429_v53 }
 0x29c   : > { %v627_v54 = vpop.eup %626 }
 0x29d   : > { %v431_v55 = vmul.f32 %v627_v54, %v429_v53  ;;  %vm437_vm3 = vweird.f32 %v627_v54 }
 0x29e   : > { %vm438_vm5 = vmor %vm436_vm4, %vm437_vm3 }
 0x29f   : > { %v432_v56 = vmul.f32 %v627_v54, %v431_v55 }
 0x2a1   : > { %v433_v57 = vmul.f32 0.5, %v432_v56 }
 0x2a3   : > { %v434_v58 = vsub.f32 1.5, %v433_v57 }
 0x2a5   : > { %v435_v59 = vmul.f32 %v627_v54, %v434_v58 }
 0x2a7   : > { %v439_v60 = vsel %vm438_vm5, %v627_v54, %v435_v59 }
 0x2a8   : > { %v440_v61 = vmul.f32 %v439_v60, %v415_v41 }
 0x2aa   : > { %v441_v62 = vpack.c.bf16 %v440_v61, %v440_v61 }
 0x2ac   : > { %443 = vst.msk [vmem:[%s284_s25] sm:$0xf] %vm442_vm6, %v441_v62 }
 0x2ad PF: > { %s15_s20 = sadd.s32 1, %s650_s20   ;;  %s759_s18 = smov %s646_s19 }
 0x2ae   : > { %p12_p5 = scmp.ge.s32.totalorder %s15_s20, 4   ;;  %s760_s19 = smov %s762_s21 }
 0x2b0   :  { %14 = sbr.rel (!%p12_p5) target bundleno = 2 (0x2), region = 87 }

</bundles_post_ra>
